<compile_context>
chip_gen: v5e
topology: v5e:2x2
jax: 0.10.0
libtpu: 0.0.40
codegen_flags: <defaults>
</compile_context>

<pallas_src>
import functools

import jax
import jax.numpy as jnp
from jax.experimental import pallas as pl
from jax.experimental.pallas import tpu as pltpu


# --------------------------------------------------------------------------
# Wrapper-side parameter preprocessing
# --------------------------------------------------------------------------
def fold_bn(gamma, beta, mean, var, eps=1e-5):
    scale = gamma / jnp.sqrt(var + eps)
    bias = beta - mean * scale
    return scale, bias


def _row_toeplitz(w_hwio, W, pad_output):
    """(3,3,Cin,Cout) conv kernel -> per-dy block-Toeplitz matrices.

    T[dy][(wo+dx)*Cin + ci, wo*Cout + co] = w[dy, dx, ci, co]

    so (padded row h+dy, flattened over (W+2, Cin)) @ T[dy] gives tap dy's
    contribution to the whole output row in lane-dense (W*Cout) layout.
    If pad_output, output columns get Cout zero columns on each side so the
    result is already a W-padded row (used for the conv1 -> conv2 handoff).
    """
    kh, kw, cin, cout = w_hwio.shape
    wi = jnp.arange(W + 2)[:, None, None]        # padded input column
    wo = jnp.arange(W)[None, :, None]            # output column
    dx = jnp.arange(kw)[None, None, :]
    sel = (wi == wo + dx).astype(w_hwio.dtype)   # (W+2, W, kw)
    # T[dy, wi, ci, wo, co] = sum_dx sel[wi, wo, dx] * w[dy, dx, ci, co]
    T = jnp.einsum("iwx,yxco->yicwo", sel, w_hwio)
    T = T.reshape(kh, (W + 2) * cin, W * cout)
    if pad_output:
        T = jnp.pad(T, ((0, 0), (0, 0), (cout, cout)))
    return T


# --------------------------------------------------------------------------
# Fused kernel: conv1+BN+ReLU -> conv2+BN+ReLU -> SqueezeExcitation
# --------------------------------------------------------------------------
def _conv_layer_kernel(x_ref, t1_ref, b1_ref, t2_ref, b2_ref,
                       sw1_ref, sb1_ref, sw2_ref, sb2_ref,
                       ssum_ref, sexp_ref, o_ref, ypad_ref,
                       *, H, W, C, use_se):
    # x_ref:  (1, H+2, (W+2)*Cin)  padded image, (W,C) flattened onto lanes
    # t1_ref: (3, (W+2)*Cin, (W+2)*C)  conv1 block-Toeplitz (BN scale folded)
    # b1_ref: (1, (W+2)*C)             conv1 bias (zero on W-pad columns)
    # t2_ref: (3, (W+2)*C, W*C)        conv2 block-Toeplitz
    # b2_ref: (1, W*C)
    # sw1/sb1/sw2/sb2: SE linears      ssum: (W*C, C)   sexp: (C, W*C)
    # o_ref:  (1, H, W*C)              ypad_ref: (H+2, (W+2)*C) VMEM scratch
    wp = (W + 2) * C

    # ---- conv1 + folded BN + ReLU: 3 row-shifted MXU matmuls ----
    acc1 = jnp.zeros((H, wp), jnp.float32)
    for dy in range(3):
        acc1 += jnp.dot(x_ref[0, dy:dy + H, :], t1_ref[dy],
                        preferred_element_type=jnp.float32)
    y1 = jnp.maximum(acc1 + b1_ref[...], 0.0)        # (H, (W+2)*C), zero W-borders

    # ---- re-pad rows in VMEM for conv2 ('same' padding, no HBM trip) ----
    ypad_ref[...] = jnp.zeros_like(ypad_ref)
    ypad_ref[1:H + 1, :] = y1

    # ---- conv2 + folded BN + ReLU ----
    acc2 = jnp.zeros((H, W * C), jnp.float32)
    for dy in range(3):
        acc2 += jnp.dot(ypad_ref[dy:dy + H, :], t2_ref[dy],
                        preferred_element_type=jnp.float32)
    y2 = jnp.maximum(acc2 + b2_ref[...], 0.0)        # (H, W*C), lane-dense

    # ---- SqueezeExcitation on the VMEM-resident activation ----
    if use_se:
        col_sum = jnp.sum(y2, axis=0, keepdims=True)                    # (1, W*C)
        pool = jnp.dot(col_sum, ssum_ref[...],
                       preferred_element_type=jnp.float32) * (1.0 / (H * W))  # (1, C)
        h = jnp.maximum(
            jnp.dot(pool, sw1_ref[...], preferred_element_type=jnp.float32)
            + sb1_ref[...], 0.0)                                        # (1, C//r)
        s = jax.nn.sigmoid(
            jnp.dot(h, sw2_ref[...], preferred_element_type=jnp.float32)
            + sb2_ref[...])                                             # (1, C)
        s_flat = jnp.dot(s, sexp_ref[...],
                         preferred_element_type=jnp.float32)            # (1, W*C)
        y2 = y2 * s_flat

    o_ref[0] = y2                                    # unmasked 256-lane stores


# --------------------------------------------------------------------------
# ConvLayer forward (NCHW in / NCHW out, like the PyTorch module)
# --------------------------------------------------------------------------
def conv_layer_forward(x_nchw, params, use_se=True, use_dropout=False):
    N, Cin, H, W = x_nchw.shape
    C = params["w_conv1"].shape[-1]

    # NCHW -> NHWC -> pad H/W by 1 -> flatten (W+2, Cin) onto the lane axis.
    x = jnp.transpose(x_nchw, (0, 2, 3, 1)).astype(jnp.float32)
    x_flat = jnp.pad(x, ((0, 0), (1, 1), (1, 1), (0, 0))).reshape(
        N, H + 2, (W + 2) * Cin)

    # Fold inference BatchNorm into conv weights / biases (once, in XLA).
    s1, bn_b1 = fold_bn(*params["bn1"])
    s2, bn_b2 = fold_bn(*params["bn2"])
    t1 = _row_toeplitz(params["w_conv1"] * s1, W, pad_output=True)
    t2 = _row_toeplitz(params["w_conv2"] * s2, W, pad_output=False)
    b1 = params["b_conv1"] * s1 + bn_b1
    b2 = params["b_conv2"] * s2 + bn_b2
    b1_flat = jnp.pad(jnp.tile(b1, W), (C, C)).reshape(1, (W + 2) * C)
    b2_flat = jnp.tile(b2, W).reshape(1, W * C)

    # SE params + constant channel-sum / channel-expand matrices.
    if use_se:
        sw1, sb1 = params["se_w1"], params["se_b1"]
        sw2, sb2 = params["se_w2"], params["se_b2"]
    else:
        sw1 = jnp.zeros((C, 1), jnp.float32)
        sb1 = jnp.zeros((1,), jnp.float32)
        sw2 = jnp.zeros((1, C), jnp.float32)
        sb2 = jnp.zeros((C,), jnp.float32)
    Ch = sw1.shape[-1]
    eye = jnp.eye(C, dtype=jnp.float32)
    s_sum = jnp.tile(eye, (W, 1))      # (W*C, C): per-channel sum across W
    s_exp = jnp.tile(eye, (1, W))      # (C, W*C): broadcast channel scale

    kernel = functools.partial(_conv_layer_kernel, H=H, W=W, C=C, use_se=use_se)
    out = pl.pallas_call(
        kernel,
        out_shape=jax.ShapeDtypeStruct((N, H, W * C), jnp.float32),
        grid_spec=pltpu.PrefetchScalarGridSpec(
            num_scalar_prefetch=0,
            grid=(N,),
            in_specs=[
                pl.BlockSpec((1, H + 2, (W + 2) * Cin), lambda b: (b, 0, 0)),
                pl.BlockSpec((3, (W + 2) * Cin, (W + 2) * C), lambda b: (0, 0, 0)),
                pl.BlockSpec((1, (W + 2) * C), lambda b: (0, 0)),
                pl.BlockSpec((3, (W + 2) * C, W * C), lambda b: (0, 0, 0)),
                pl.BlockSpec((1, W * C), lambda b: (0, 0)),
                pl.BlockSpec((C, Ch), lambda b: (0, 0)),
                pl.BlockSpec((1, Ch), lambda b: (0, 0)),
                pl.BlockSpec((Ch, C), lambda b: (0, 0)),
                pl.BlockSpec((1, C), lambda b: (0, 0)),
                pl.BlockSpec((W * C, C), lambda b: (0, 0)),
                pl.BlockSpec((C, W * C), lambda b: (0, 0)),
            ],
            out_specs=pl.BlockSpec((1, H, W * C), lambda b: (b, 0, 0)),
            scratch_shapes=[pltpu.VMEM((H + 2, (W + 2) * C), jnp.float32)],
        ),
        compiler_params=pltpu.CompilerParams(
            dimension_semantics=("parallel",)),   # batch axis -> v7x dual-TC
    )(x_flat, t1, b1_flat, t2, b2_flat,
      sw1, sb1.reshape(1, Ch), sw2, sb2.reshape(1, C), s_sum, s_exp)

    y = out.reshape(N, H, W, C)
    if use_dropout:
        pass  # Dropout2d is identity in inference mode.
    return jnp.transpose(y, (0, 3, 1, 2))  # NHWC -> NCHW


# --------------------------------------------------------------------------
# Pure-JAX reference (for correctness check)
# --------------------------------------------------------------------------
def reference_forward(x_nchw, params, use_se=True):
    x = jnp.transpose(x_nchw, (0, 2, 3, 1))

    def conv(x, w, b):
        return jax.lax.conv_general_dilated(
            x, w, window_strides=(1, 1), padding="SAME",
            dimension_numbers=("NHWC", "HWIO", "NHWC")) + b

    s1, b1 = fold_bn(*params["bn1"])
    s2, b2 = fold_bn(*params["bn2"])
    y = jnp.maximum(conv(x, params["w_conv1"], params["b_conv1"]) * s1 + b1, 0.0)
    y = jnp.maximum(conv(y, params["w_conv2"], params["b_conv2"]) * s2 + b2, 0.0)
    if use_se:
        p = jnp.mean(y, axis=(1, 2))                               # (N, C)
        h = jnp.maximum(p @ params["se_w1"] + params["se_b1"], 0.0)
        s = jax.nn.sigmoid(h @ params["se_w2"] + params["se_b2"])
        y = y * s[:, None, None, :]
    return jnp.transpose(y, (0, 3, 1, 2))


if __name__ == "__main__":
    key = jax.random.PRNGKey(0)
    N, Cin, Cout, H, W = 2, 4, 16, 16, 16
    ratio = 8
    Chid = Cout // ratio

    ks = jax.random.split(key, 12)
    params = {
        "w_conv1": 0.1 * jax.random.normal(ks[0], (3, 3, Cin, Cout), jnp.float32),
        "b_conv1": 0.1 * jax.random.normal(ks[1], (Cout,), jnp.float32),
        "w_conv2": 0.1 * jax.random.normal(ks[2], (3, 3, Cout, Cout), jnp.float32),
        "b_conv2": 0.1 * jax.random.normal(ks[3], (Cout,), jnp.float32),
        # BN: (gamma, beta, running_mean, running_var)
        "bn1": (1.0 + 0.1 * jax.random.normal(ks[4], (Cout,), jnp.float32),
                0.1 * jax.random.normal(ks[5], (Cout,), jnp.float32),
                0.1 * jax.random.normal(ks[6], (Cout,), jnp.float32),
                1.0 + 0.1 * jax.random.uniform(ks[7], (Cout,), jnp.float32)),
        "bn2": (1.0 + 0.1 * jax.random.normal(ks[8], (Cout,), jnp.float32),
                0.1 * jax.random.normal(ks[9], (Cout,), jnp.float32),
                0.1 * jax.random.normal(ks[10], (Cout,), jnp.float32),
                1.0 + 0.1 * jax.random.uniform(ks[11], (Cout,), jnp.float32)),
        # SqueezeExcitation linears (stored as (in, out) for y @ W)
        "se_w1": 0.2 * jax.random.normal(jax.random.PRNGKey(100), (Cout, Chid), jnp.float32),
        "se_b1": 0.1 * jax.random.normal(jax.random.PRNGKey(101), (Chid,), jnp.float32),
        "se_w2": 0.2 * jax.random.normal(jax.random.PRNGKey(102), (Chid, Cout), jnp.float32),
        "se_b2": 0.1 * jax.random.normal(jax.random.PRNGKey(103), (Cout,), jnp.float32),
    }

    x = jax.random.normal(jax.random.PRNGKey(7), (N, Cin, H, W), jnp.float32)

    out = conv_layer_forward(x, params, use_se=True, use_dropout=False)
    out = jax.block_until_ready(out)

    ref = reference_forward(x, params, use_se=True)
    assert out.shape == (N, Cout, H, W), out.shape
    assert jnp.allclose(out, ref, atol=1e-4, rtol=1e-4), \
        float(jnp.max(jnp.abs(out - ref)))

    print("KERNEL_OK")
</pallas_src>

<mosaic_0001>
module attributes {stable_mosaic.version = 11 : i64} {
  func.func @_conv_layer_kernel(%arg0: i32, %arg1: memref<1x18x72xf32, #tpu.memory_space<vmem>>, %arg2: memref<3x72x288xf32, #tpu.memory_space<vmem>>, %arg3: memref<1x288xf32, #tpu.memory_space<vmem>>, %arg4: memref<3x288x256xf32, #tpu.memory_space<vmem>>, %arg5: memref<1x256xf32, #tpu.memory_space<vmem>>, %arg6: memref<16x2xf32, #tpu.memory_space<vmem>>, %arg7: memref<1x2xf32, #tpu.memory_space<vmem>>, %arg8: memref<2x16xf32, #tpu.memory_space<vmem>>, %arg9: memref<1x16xf32, #tpu.memory_space<vmem>>, %arg10: memref<256x16xf32, #tpu.memory_space<vmem>>, %arg11: memref<16x256xf32, #tpu.memory_space<vmem>>, %arg12: memref<1x16x256xf32, #tpu.memory_space<vmem>>, %arg13: memref<18x288xf32, #tpu.memory_space<vmem>>) attributes {dimension_semantics = [#tpu.dimension_semantics<parallel>], iteration_bounds = array<i64: 2>, scalar_prefetch = 0 : i64, scratch_operands = 1 : i64, tpu.core_type = #tpu.core_type<tc>, window_params = [{transform_indices = @transform_0, window_bounds = array<i64: 1, 18, 72>}, {pipeline_mode = #tpu.pipeline_mode<synchronous>, transform_indices = @transform_1, window_bounds = array<i64: 3, 72, 288>}, {pipeline_mode = #tpu.pipeline_mode<synchronous>, transform_indices = @transform_2, window_bounds = array<i64: 1, 288>}, {pipeline_mode = #tpu.pipeline_mode<synchronous>, transform_indices = @transform_3, window_bounds = array<i64: 3, 288, 256>}, {pipeline_mode = #tpu.pipeline_mode<synchronous>, transform_indices = @transform_4, window_bounds = array<i64: 1, 256>}, {pipeline_mode = #tpu.pipeline_mode<synchronous>, transform_indices = @transform_5, window_bounds = array<i64: 16, 2>}, {pipeline_mode = #tpu.pipeline_mode<synchronous>, transform_indices = @transform_6, window_bounds = array<i64: 1, 2>}, {pipeline_mode = #tpu.pipeline_mode<synchronous>, transform_indices = @transform_7, window_bounds = array<i64: 2, 16>}, {pipeline_mode = #tpu.pipeline_mode<synchronous>, transform_indices = @transform_8, window_bounds = array<i64: 1, 16>}, {pipeline_mode = #tpu.pipeline_mode<synchronous>, transform_indices = @transform_9, window_bounds = array<i64: 256, 16>}, {pipeline_mode = #tpu.pipeline_mode<synchronous>, transform_indices = @transform_10, window_bounds = array<i64: 16, 256>}, {transform_indices = @transform_11, window_bounds = array<i64: 1, 16, 256>}]} {
    %cst = arith.constant 0.000000e+00 : f32
    %0 = vector.broadcast %cst : f32 to vector<16x288xf32>
    %c0 = arith.constant 0 : index
    %c0_0 = arith.constant 0 : index
    %c0_1 = arith.constant 0 : index
    %1 = vector.load %arg1[%c0, %c0_0, %c0_1] : memref<1x18x72xf32, #tpu.memory_space<vmem>>, vector<1x16x72xf32>
    %2 = vector.shape_cast %1 : vector<1x16x72xf32> to vector<16x72xf32>
    %c0_2 = arith.constant 0 : index
    %c0_3 = arith.constant 0 : index
    %c0_4 = arith.constant 0 : index
    %3 = vector.load %arg2[%c0_2, %c0_3, %c0_4] : memref<3x72x288xf32, #tpu.memory_space<vmem>>, vector<1x72x288xf32>
    %4 = vector.shape_cast %3 : vector<1x72x288xf32> to vector<72x288xf32>
    %cst_5 = arith.constant dense<0.000000e+00> : vector<16x288xf32>
    %5 = tpu.matmul %2, %4, %cst_5 {dimension_numbers = #tpu.dot_dimension_numbers<[1], [0], [0], [1], [0, 0, 1, 1], [], []>} : vector<16x72xf32>, vector<72x288xf32>, vector<16x288xf32> -> vector<16x288xf32>
    %6 = arith.addf %0, %5 : vector<16x288xf32>
    %c0_6 = arith.constant 0 : index
    %c1 = arith.constant 1 : index
    %c0_7 = arith.constant 0 : index
    %7 = vector.load %arg1[%c0_6, %c1, %c0_7] : memref<1x18x72xf32, #tpu.memory_space<vmem>>, vector<1x16x72xf32>
    %8 = vector.shape_cast %7 : vector<1x16x72xf32> to vector<16x72xf32>
    %c1_8 = arith.constant 1 : index
    %c0_9 = arith.constant 0 : index
    %c0_10 = arith.constant 0 : index
    %9 = vector.load %arg2[%c1_8, %c0_9, %c0_10] : memref<3x72x288xf32, #tpu.memory_space<vmem>>, vector<1x72x288xf32>
    %10 = vector.shape_cast %9 : vector<1x72x288xf32> to vector<72x288xf32>
    %cst_11 = arith.constant dense<0.000000e+00> : vector<16x288xf32>
    %11 = tpu.matmul %8, %10, %cst_11 {dimension_numbers = #tpu.dot_dimension_numbers<[1], [0], [0], [1], [0, 0, 1, 1], [], []>} : vector<16x72xf32>, vector<72x288xf32>, vector<16x288xf32> -> vector<16x288xf32>
    %12 = arith.addf %6, %11 : vector<16x288xf32>
    %c0_12 = arith.constant 0 : index
    %c2 = arith.constant 2 : index
    %c0_13 = arith.constant 0 : index
    %13 = vector.load %arg1[%c0_12, %c2, %c0_13] : memref<1x18x72xf32, #tpu.memory_space<vmem>>, vector<1x16x72xf32>
    %14 = vector.shape_cast %13 : vector<1x16x72xf32> to vector<16x72xf32>
    %c2_14 = arith.constant 2 : index
    %c0_15 = arith.constant 0 : index
    %c0_16 = arith.constant 0 : index
    %15 = vector.load %arg2[%c2_14, %c0_15, %c0_16] : memref<3x72x288xf32, #tpu.memory_space<vmem>>, vector<1x72x288xf32>
    %16 = vector.shape_cast %15 : vector<1x72x288xf32> to vector<72x288xf32>
    %cst_17 = arith.constant dense<0.000000e+00> : vector<16x288xf32>
    %17 = tpu.matmul %14, %16, %cst_17 {dimension_numbers = #tpu.dot_dimension_numbers<[1], [0], [0], [1], [0, 0, 1, 1], [], []>} : vector<16x72xf32>, vector<72x288xf32>, vector<16x288xf32> -> vector<16x288xf32>
    %18 = arith.addf %12, %17 : vector<16x288xf32>
    %c0_18 = arith.constant 0 : index
    %c0_19 = arith.constant 0 : index
    %19 = vector.load %arg3[%c0_18, %c0_19] : memref<1x288xf32, #tpu.memory_space<vmem>>, vector<1x288xf32>
    %20 = vector.broadcast %19 : vector<1x288xf32> to vector<16x288xf32>
    %21 = arith.addf %18, %20 : vector<16x288xf32>
    %cst_20 = arith.constant 0.000000e+00 : f32
    %22 = vector.broadcast %cst_20 : f32 to vector<16x288xf32>
    %23 = arith.maximumf %21, %22 : vector<16x288xf32>
    %cst_21 = arith.constant 0.000000e+00 : f32
    %24 = vector.broadcast %cst_21 : f32 to vector<18x288xf32>
    %c0_22 = arith.constant 0 : index
    %c0_23 = arith.constant 0 : index
    %25 = vector.load %arg13[%c0_22, %c0_23] : memref<18x288xf32, #tpu.memory_space<vmem>>, vector<18x288xf32>
    tpu.vector_store %arg13[%c0_22, %c0_23], %24 {strides = array<i32>} : memref<18x288xf32, #tpu.memory_space<vmem>>, vector<18x288xf32>,
    %c1_24 = arith.constant 1 : index
    %c0_25 = arith.constant 0 : index
    %26 = vector.load %arg13[%c1_24, %c0_25] : memref<18x288xf32, #tpu.memory_space<vmem>>, vector<16x288xf32>
    tpu.vector_store %arg13[%c1_24, %c0_25], %23 {strides = array<i32>} : memref<18x288xf32, #tpu.memory_space<vmem>>, vector<16x288xf32>,
    %cst_26 = arith.constant 0.000000e+00 : f32
    %27 = vector.broadcast %cst_26 : f32 to vector<16x256xf32>
    %c0_27 = arith.constant 0 : index
    %c0_28 = arith.constant 0 : index
    %28 = vector.load %arg13[%c0_27, %c0_28] : memref<18x288xf32, #tpu.memory_space<vmem>>, vector<16x288xf32>
    %c0_29 = arith.constant 0 : index
    %c0_30 = arith.constant 0 : index
    %c0_31 = arith.constant 0 : index
    %29 = vector.load %arg4[%c0_29, %c0_30, %c0_31] : memref<3x288x256xf32, #tpu.memory_space<vmem>>, vector<1x288x256xf32>
    %30 = vector.shape_cast %29 : vector<1x288x256xf32> to vector<288x256xf32>
    %cst_32 = arith.constant dense<0.000000e+00> : vector<16x256xf32>
    %31 = tpu.matmul %28, %30, %cst_32 {dimension_numbers = #tpu.dot_dimension_numbers<[1], [0], [0], [1], [0, 0, 1, 1], [], []>} : vector<16x288xf32>, vector<288x256xf32>, vector<16x256xf32> -> vector<16x256xf32>
    %32 = arith.addf %27, %31 : vector<16x256xf32>
    %c1_33 = arith.constant 1 : index
    %c0_34 = arith.constant 0 : index
    %33 = vector.load %arg13[%c1_33, %c0_34] : memref<18x288xf32, #tpu.memory_space<vmem>>, vector<16x288xf32>
    %c1_35 = arith.constant 1 : index
    %c0_36 = arith.constant 0 : index
    %c0_37 = arith.constant 0 : index
    %34 = vector.load %arg4[%c1_35, %c0_36, %c0_37] : memref<3x288x256xf32, #tpu.memory_space<vmem>>, vector<1x288x256xf32>
    %35 = vector.shape_cast %34 : vector<1x288x256xf32> to vector<288x256xf32>
    %cst_38 = arith.constant dense<0.000000e+00> : vector<16x256xf32>
    %36 = tpu.matmul %33, %35, %cst_38 {dimension_numbers = #tpu.dot_dimension_numbers<[1], [0], [0], [1], [0, 0, 1, 1], [], []>} : vector<16x288xf32>, vector<288x256xf32>, vector<16x256xf32> -> vector<16x256xf32>
    %37 = arith.addf %32, %36 : vector<16x256xf32>
    %c2_39 = arith.constant 2 : index
    %c0_40 = arith.constant 0 : index
    %38 = vector.load %arg13[%c2_39, %c0_40] : memref<18x288xf32, #tpu.memory_space<vmem>>, vector<16x288xf32>
    %c2_41 = arith.constant 2 : index
    %c0_42 = arith.constant 0 : index
    %c0_43 = arith.constant 0 : index
    %39 = vector.load %arg4[%c2_41, %c0_42, %c0_43] : memref<3x288x256xf32, #tpu.memory_space<vmem>>, vector<1x288x256xf32>
    %40 = vector.shape_cast %39 : vector<1x288x256xf32> to vector<288x256xf32>
    %cst_44 = arith.constant dense<0.000000e+00> : vector<16x256xf32>
    %41 = tpu.matmul %38, %40, %cst_44 {dimension_numbers = #tpu.dot_dimension_numbers<[1], [0], [0], [1], [0, 0, 1, 1], [], []>} : vector<16x288xf32>, vector<288x256xf32>, vector<16x256xf32> -> vector<16x256xf32>
    %42 = arith.addf %37, %41 : vector<16x256xf32>
    %c0_45 = arith.constant 0 : index
    %c0_46 = arith.constant 0 : index
    %43 = vector.load %arg5[%c0_45, %c0_46] : memref<1x256xf32, #tpu.memory_space<vmem>>, vector<1x256xf32>
    %44 = vector.broadcast %43 : vector<1x256xf32> to vector<16x256xf32>
    %45 = arith.addf %42, %44 : vector<16x256xf32>
    %cst_47 = arith.constant 0.000000e+00 : f32
    %46 = vector.broadcast %cst_47 : f32 to vector<16x256xf32>
    %47 = arith.maximumf %45, %46 : vector<16x256xf32>
    %cst_48 = arith.constant dense<0.000000e+00> : vector<256xf32>
    %48 = vector.multi_reduction <add>, %47, %cst_48 [0] : vector<16x256xf32> to vector<256xf32>
    %49 = vector.shape_cast %48 : vector<256xf32> to vector<1x256xf32>
    %c0_49 = arith.constant 0 : index
    %c0_50 = arith.constant 0 : index
    %50 = vector.load %arg10[%c0_49, %c0_50] : memref<256x16xf32, #tpu.memory_space<vmem>>, vector<256x16xf32>
    %cst_51 = arith.constant dense<0.000000e+00> : vector<1x16xf32>
    %51 = tpu.matmul %49, %50, %cst_51 {dimension_numbers = #tpu.dot_dimension_numbers<[1], [0], [0], [1], [0, 0, 1, 1], [], []>} : vector<1x256xf32>, vector<256x16xf32>, vector<1x16xf32> -> vector<1x16xf32>
    %cst_52 = arith.constant 3.906250e-03 : f32
    %52 = vector.broadcast %cst_52 : f32 to vector<1x16xf32>
    %53 = arith.mulf %51, %52 : vector<1x16xf32>
    %c0_53 = arith.constant 0 : index
    %c0_54 = arith.constant 0 : index
    %54 = vector.load %arg6[%c0_53, %c0_54] : memref<16x2xf32, #tpu.memory_space<vmem>>, vector<16x2xf32>
    %cst_55 = arith.constant dense<0.000000e+00> : vector<1x2xf32>
    %55 = tpu.matmul %53, %54, %cst_55 {dimension_numbers = #tpu.dot_dimension_numbers<[1], [0], [0], [1], [0, 0, 1, 1], [], []>} : vector<1x16xf32>, vector<16x2xf32>, vector<1x2xf32> -> vector<1x2xf32>
    %c0_56 = arith.constant 0 : index
    %c0_57 = arith.constant 0 : index
    %56 = vector.load %arg7[%c0_56, %c0_57] : memref<1x2xf32, #tpu.memory_space<vmem>>, vector<1x2xf32>
    %57 = arith.addf %55, %56 : vector<1x2xf32>
    %cst_58 = arith.constant 0.000000e+00 : f32
    %58 = vector.broadcast %cst_58 : f32 to vector<1x2xf32>
    %59 = arith.maximumf %57, %58 : vector<1x2xf32>
    %c0_59 = arith.constant 0 : index
    %c0_60 = arith.constant 0 : index
    %60 = vector.load %arg8[%c0_59, %c0_60] : memref<2x16xf32, #tpu.memory_space<vmem>>, vector<2x16xf32>
    %cst_61 = arith.constant dense<0.000000e+00> : vector<1x16xf32>
    %61 = tpu.matmul %59, %60, %cst_61 {dimension_numbers = #tpu.dot_dimension_numbers<[1], [0], [0], [1], [0, 0, 1, 1], [], []>} : vector<1x2xf32>, vector<2x16xf32>, vector<1x16xf32> -> vector<1x16xf32>
    %c0_62 = arith.constant 0 : index
    %c0_63 = arith.constant 0 : index
    %62 = vector.load %arg9[%c0_62, %c0_63] : memref<1x16xf32, #tpu.memory_space<vmem>>, vector<1x16xf32>
    %63 = arith.addf %61, %62 : vector<1x16xf32>
    %64 = arith.negf %63 : vector<1x16xf32>
    %65 = math.exp %64 : vector<1x16xf32>
    %cst_64 = arith.constant 1.000000e+00 : f32
    %66 = vector.broadcast %cst_64 : f32 to vector<1x16xf32>
    %67 = arith.addf %66, %65 : vector<1x16xf32>
    %68 = arith.divf %66, %67 : vector<1x16xf32>
    %c0_65 = arith.constant 0 : index
    %c0_66 = arith.constant 0 : index
    %69 = vector.load %arg11[%c0_65, %c0_66] : memref<16x256xf32, #tpu.memory_space<vmem>>, vector<16x256xf32>
    %cst_67 = arith.constant dense<0.000000e+00> : vector<1x256xf32>
    %70 = tpu.matmul %68, %69, %cst_67 {dimension_numbers = #tpu.dot_dimension_numbers<[1], [0], [0], [1], [0, 0, 1, 1], [], []>} : vector<1x16xf32>, vector<16x256xf32>, vector<1x256xf32> -> vector<1x256xf32>
    %71 = vector.broadcast %70 : vector<1x256xf32> to vector<16x256xf32>
    %72 = arith.mulf %47, %71 : vector<16x256xf32>
    %c0_68 = arith.constant 0 : index
    %c0_69 = arith.constant 0 : index
    %c0_70 = arith.constant 0 : index
    %73 = vector.load %arg12[%c0_68, %c0_69, %c0_70] : memref<1x16x256xf32, #tpu.memory_space<vmem>>, vector<1x16x256xf32>
    %74 = vector.shape_cast %73 : vector<1x16x256xf32> to vector<16x256xf32>
    %75 = vector.shape_cast %72 : vector<16x256xf32> to vector<1x16x256xf32>
    tpu.vector_store %arg12[%c0_68, %c0_69, %c0_70], %75 {strides = array<i32>} : memref<1x16x256xf32, #tpu.memory_space<vmem>>, vector<1x16x256xf32>,
    return
  }
  func.func @transform_0(%arg0: i32) -> (i32, i32, i32) {
    %c0_i32 = arith.constant 0 : i32
    %c0_i32_0 = arith.constant 0 : i32
    %c0_i32_1 = arith.constant 0 : i32
    return %arg0, %c0_i32, %c0_i32_0 : i32, i32, i32
  }
  func.func @transform_1(%arg0: i32) -> (i32, i32, i32) {
    %c0_i32 = arith.constant 0 : i32
    %c0_i32_0 = arith.constant 0 : i32
    %c0_i32_1 = arith.constant 0 : i32
    %c0_i32_2 = arith.constant 0 : i32
    return %c0_i32, %c0_i32_0, %c0_i32_1 : i32, i32, i32
  }
  func.func @transform_2(%arg0: i32) -> (i32, i32) {
    %c0_i32 = arith.constant 0 : i32
    %c0_i32_0 = arith.constant 0 : i32
    %c0_i32_1 = arith.constant 0 : i32
    return %c0_i32, %c0_i32_0 : i32, i32
  }
  func.func @transform_3(%arg0: i32) -> (i32, i32, i32) {
    %c0_i32 = arith.constant 0 : i32
    %c0_i32_0 = arith.constant 0 : i32
    %c0_i32_1 = arith.constant 0 : i32
    %c0_i32_2 = arith.constant 0 : i32
    return %c0_i32, %c0_i32_0, %c0_i32_1 : i32, i32, i32
  }
  func.func @transform_4(%arg0: i32) -> (i32, i32) {
    %c0_i32 = arith.constant 0 : i32
    %c0_i32_0 = arith.constant 0 : i32
    %c0_i32_1 = arith.constant 0 : i32
    return %c0_i32, %c0_i32_0 : i32, i32
  }
  func.func @transform_5(%arg0: i32) -> (i32, i32) {
    %c0_i32 = arith.constant 0 : i32
    %c0_i32_0 = arith.constant 0 : i32
    %c0_i32_1 = arith.constant 0 : i32
    return %c0_i32, %c0_i32_0 : i32, i32
  }
  func.func @transform_6(%arg0: i32) -> (i32, i32) {
    %c0_i32 = arith.constant 0 : i32
    %c0_i32_0 = arith.constant 0 : i32
    %c0_i32_1 = arith.constant 0 : i32
    return %c0_i32, %c0_i32_0 : i32, i32
  }
  func.func @transform_7(%arg0: i32) -> (i32, i32) {
    %c0_i32 = arith.constant 0 : i32
    %c0_i32_0 = arith.constant 0 : i32
    %c0_i32_1 = arith.constant 0 : i32
    return %c0_i32, %c0_i32_0 : i32, i32
  }
  func.func @transform_8(%arg0: i32) -> (i32, i32) {
    %c0_i32 = arith.constant 0 : i32
    %c0_i32_0 = arith.constant 0 : i32
    %c0_i32_1 = arith.constant 0 : i32
    return %c0_i32, %c0_i32_0 : i32, i32
  }
  func.func @transform_9(%arg0: i32) -> (i32, i32) {
    %c0_i32 = arith.constant 0 : i32
    %c0_i32_0 = arith.constant 0 : i32
    %c0_i32_1 = arith.constant 0 : i32
    return %c0_i32, %c0_i32_0 : i32, i32
  }
  func.func @transform_10(%arg0: i32) -> (i32, i32) {
    %c0_i32 = arith.constant 0 : i32
    %c0_i32_0 = arith.constant 0 : i32
    %c0_i32_1 = arith.constant 0 : i32
    return %c0_i32, %c0_i32_0 : i32, i32
  }
  func.func @transform_11(%arg0: i32) -> (i32, i32, i32) {
    %c0_i32 = arith.constant 0 : i32
    %c0_i32_0 = arith.constant 0 : i32
    %c0_i32_1 = arith.constant 0 : i32
    return %arg0, %c0_i32, %c0_i32_0 : i32, i32, i32
  }
}

</mosaic_0001>

<bundles_post_ra>
// kernel: tpu_custom_call.1
= control target key start
LH: loop header
LB: loop body
LE: loop exit
PB: predicated region body
PF: predicated region fallthrough
CT: control target
= control target key end

     0   :  { %s2656_s0 = inlined_call_operand.vmem [shape: f32[2,18,72], index: 0, kind: input, shape index: {}]   ;;  %s2657_s1 = inlined_call_operand.hbm [shape: f32[3,72,288], index: 1, kind: input, shape index: {}]   ;;  %s2658_s2 = inlined_call_operand.vmem [shape: f32[1,288], index: 2, kind: input, shape index: {}]   ;;  %s2659_s3 = inlined_call_operand.hbm [shape: f32[3,288,256], index: 3, kind: input, shape index: {}]   ;;  %s2660_s4 = inlined_call_operand.vmem [shape: f32[1,256], index: 4, kind: input, shape index: {}]   ;;  %s2661_s5 = inlined_call_operand.vmem [shape: f32[16,2], index: 5, kind: input, shape index: {}]   ;;  %s2662_s6 = inlined_call_operand.vmem [shape: f32[1,2], index: 6, kind: input, shape index: {}]   ;;  %s2663_s7 = inlined_call_operand.vmem [shape: f32[2,16], index: 7, kind: input, shape index: {}]   ;;  %s2664_s8 = inlined_call_operand.vmem [shape: f32[1,16], index: 8, kind: input, shape index: {}]   ;;  %s2665_s9 = inlined_call_operand.vmem [shape: f32[256,16], index: 9, kind: input, shape index: {}]   ;;  %s2666_s10 = inlined_call_operand.vmem [shape: f32[16,256], index: 10, kind: input, shape index: {}]   ;;  %s2667_s11 = inlined_call_operand.hbm [shape: f32[2,16,256], index: 11, kind: output, shape index: {}]  }
   0x1   :  { %2669 = sst [smem:[#allocation14_spill]] %s2657_s1 }
   0x2   :  { %16 = vsyncpa [#allocation4], 0 }
   0x3   :  { %17 = vsyncpa [#allocation7], 0 }
   0x4   :  { %18 = vsyncpa [#allocation5], 0 }
   0x5   :  { %20 = vsyncpa [#allocation5 + $0x1], 0  ;;  %s2189_s17 = smov 0   ;;  %s2191_s18 = smov 0  }
   0x6   :  { %s2193_s19 = smov 0   ;;  %s2195_s20 = smov 0  }
   0x7 LB: > { %2670 = sst [smem:[#allocation12_spill]] %s2114_s19  ;;  %s2210_s21 = sadd.s32 4294967295, %s2118_s20   ;;  %s2118_s20 = sphi %s2195_s20, %s2680_s20   ;;  %s2114_s19 = sphi %s2193_s19, %s2677_s19   ;;  %s2110_s18 = sphi %s2191_s18, %s2679_s18   ;;  %s2106_s17 = sphi %s2189_s17, %s2678_s17  }
   0x8   : > { %s1864_s22 = sadd.s32 4294967294, %s2118_s20   ;;  %s2214_s23 = sadd.s32 1, %s2118_s20  }
   0x9   : > { %s269_s24 = sadd.s32 1, %s2114_s19  ;;  %s266_s25 = ssub.s32 %s2118_s20, %s2214_s23 }
   0xa   : > { %p279_p0 = scmp.ne.s32.totalorder %s2114_s19, %s2110_s18  ;;  %p267_p1 = scmp.eq.s32.totalorder %s266_s25, 0 }
   0xb   : > { %p280_p2 = scmp.eq.s32.totalorder %s2210_s21, 1  ;;  %p285_p3 = scmp.ne.s32.totalorder %s2110_s18, %s2106_s17 }
   0xc   : > { %p286_p4 = scmp.eq.s32.totalorder %s1864_s22, 1  ;;  %p1865_p7 = scmp.ge.s32.totalorder %s2118_s20, 1 }
   0xd   : > { %s2225_s26 = scalar_select %p267_p1, %s2114_s19, %s269_s24  }
   0xe   : > { %p2227_p5 = por %p280_p2, %p279_p0  ;;  %p2231_p6 = por %p286_p4, %p285_p3 }
   0xf   : > { %2671 = sst [smem:[#allocation13_spill]] %s2225_s26  ;;  %p293_p8 = scmp.lt.s32.totalorder %s2118_s20, 3 }
  0x10   : > { %p1938_p9 = scmp.eq.s32.totalorder %s2210_s21, 0  ;;  %s2675_s1 = sld [smem:[#allocation14_spill]] }
  0x11   : > { %p2238_p10 = pnand %p1865_p7, %p293_p8  ;;  %s2120_s14 = smov [#allocation3]  }
  0x12   : > { %s306_s15 = sshll.u32 %s2120_s14, 4  ;;  %s321_s24 = sshll.u32 %s2659_s3, 4  ;;  %s307_s15 = int_to_ptr.vmem [resolvable:$true] %s306_s15  ;;  %s322_s24 = int_to_ptr.hbm [resolvable:$true] %s321_s24 }
  0x13   : > { %p1927_p11 = pneg %p2238_p10  ;;  %s2121_s25 = smov 384  }
  0x14   : > { %s2122_s26 = smov 24   ;;  %s2123_s19 = smov [#allocation6]  }
  0x15   : > { %p1928_p12 = pnand %p1938_p9, %p1927_p11  ;;  %s323_s30 = sshll.u32 %s2123_s19, 4  ;;  %s324_s30 = int_to_ptr.vmem [resolvable:$true] %s323_s30 }
  0x16   : > { %s304_s13 = sshll.u32 %s2675_s1, 4  ;;  %s2124_s12 = smov 256   ;;  %s305_s13 = int_to_ptr.hbm [resolvable:$true] %s304_s13 }
  0x17   : > { %1930 = dma.hbm_to_vmem [thread:$0]  (!%p1928_p12), %s305_s13, 10368, %s307_s15, [#allocation4], %s2121_s25, %s2121_s25, %s2122_s26  }
  0x18   : > { %s2125_s1 = smov 16   ;;  %368 = sbr.rel (%p2238_p10) target bundleno = 1046 (0x416), region = 64 }
  0x19   : > { %1933 = dma.hbm_to_vmem [thread:$0]  (!%p1928_p12), %s322_s24, 27648, %s324_s30, [#allocation7], %s2124_s12, %s2124_s12, %s2125_s1  }
  0x1d   : > { %2093 = dma.done.wait (%p1938_p9), [#allocation4], 10368  }
  0x1e   : > { %2095 = vsyncadd (%p1938_p9), [#allocation4], 4294956928 }
  0x1f   : > { %2097 = dma.done.wait (%p1938_p9), [#allocation7], 27648  }
  0x20   : > { %2099 = vsyncadd (%p1938_p9), [#allocation7], 4294939648  ;;  %v475_v0 = vld [vmem:[#allocation3 + $0x198] sm:$0xff]  ;;  %v477_v1 = vld [vmem:[#allocation3 + $0x1a8] sm:$0xff]  ;;  %p414_p13 = scmp.lt.s32.totalorder %s2210_s21, 1  ;;  %vm478_vm0 = vcmask 588800  }
  0x21   : > { %v445_v2 = vld [vmem:[#allocation3 + $0xc0] sm:$0xff]  ;;  %492 = vmatpush.msra.mxu0 %v475_v0  ;;  %538 = vmatpush.msra.mxu2 %v477_v1  ;;  %v474_v5 = vld [vmem:[#allocation3 + $0x190] sm:$0xff]  ;;  %v442_v6 = vld [vmem:[#allocation3 + $0xa8] sm:$0xff]  ;;  %vm762_vm1 = vcmask 261120   ;;  %vm769_vm2 = vcmask 254976   ;;  %vm777_vm3 = vcmask 1040384  }
  0x22   : > { %v476_v3 = vld [vmem:[#allocation3 + $0x1a0] sm:$0xff]  ;;  %567 = vmatpush.msra.mxu3 %v445_v2  ;;  %v473_v7 = vld [vmem:[#allocation3 + $0x188] sm:$0xff]  ;;  %v471_v9 = vld [vmem:[#allocation3 + $0x178] sm:$0xff]  ;;  %s2266_s1 = scalar_select %p414_p13, %s2210_s21, 1  ;;  %vm973_vm4 = vcmask 1046528   ;;  %vm798_vm5 = vcmask 261121  }
  0x23   : > { %v472_v4 = vld [vmem:[#allocation3 + $0x180] sm:$0xff]  ;;  %515 = vmatpush.msra.mxu1 %v476_v3  ;;  %v469_v8 = vld [vmem:[#allocation3 + $0x168] sm:$0xff]  ;;  %539 = vmatpush.msra.mxu2 %v474_v5  ;;  %v439_v10 = vld [vmem:[#allocation3 + $0x90] sm:$0xff]  ;;  %vm805_vm6 = vcmask 253952   ;;  %vm1363_vm7 = vcmask 1045504   ;;  %vm1664_vm8 = vcmask 1041408  }
  0x24   : > { %493 = vmatpush.msra.mxu0 %v472_v4  ;;  %v470_v11 = vld [vmem:[#allocation3 + $0x170] sm:$0xff]  ;;  %568 = vmatpush.msra.mxu3 %v442_v6  ;;  %v468_v13 = vld [vmem:[#allocation3 + $0x160] sm:$0xff]  ;;  %v436_v14 = vld [vmem:[#allocation3 + $0x78] sm:$0xff]  ;;  %s1916_s19 = smul.u32 24, %s2266_s1  ;;  %vm1633_vm9 = vcmask 130048   ;;  %vm1660_vm10 = vcmask 15360  }
  0x25   : > { %516 = vmatpush.msra.mxu1 %v473_v7  ;;  %v466_v12 = vld [vmem:[#allocation3 + $0x150] sm:$0xff]  ;;  %540 = vmatpush.msra.mxu2 %v471_v9  ;;  %v467_v15 = vld [vmem:[#allocation3 + $0x158] sm:$0xff]  ;;  %v465_v17 = vld [vmem:[#allocation3 + $0x148] sm:$0xff]  ;;  %s411_s1 = sand.u32 1, %s2110_s18   ;;  %s1915_s26 = sshll.u32 %s2210_s21, 5 }
  0x26   : > { %494 = vmatpush.msra.mxu0 %v469_v8  ;;  %569 = vmatpush.msra.mxu3 %v439_v10  ;;  %v463_v16 = vld [vmem:[#allocation3 + $0x138] sm:$0xff]  ;;  %v433_v18 = vld [vmem:[#allocation3 + $0x60] sm:$0xff]  ;;  %v462_v21 = vld [vmem:[#allocation3 + $0x130] sm:$0xff]  ;;  %s2272_s13 = scalar_lea.vmem %s2656_s0, %s1916_s19  ;;  %s1872_s19 = sshll.u32 %s411_s1, 5 }
  0x27   : > { %517 = vmatpush.msra.mxu1 %v470_v11  ;;  %541 = vmatpush.msra.mxu2 %v468_v13  ;;  %v464_v19 = vld [vmem:[#allocation3 + $0x140] sm:$0xff]  ;;  %v430_v22 = vld [vmem:[#allocation3 + $0x48] sm:$0xff]  ;;  %v459_v25 = vld [vmem:[#allocation3 + $0x118] sm:$0xff]  ;;  %s1776_s14 = scalar_lea.hbm %s2667_s11, %s1915_s26  ;;  %s413_s15 = scalar_lea.vmem [#allocation8], %s1872_s19 }
  0x28   : > { %495 = vmatpush.msra.mxu0 %v466_v12  ;;  %570 = vmatpush.msra.mxu3 %v436_v14  ;;  %v460_v20 = vld [vmem:[#allocation3 + $0x120] sm:$0xff]  ;;  %v461_v23 = vld [vmem:[#allocation3 + $0x128] sm:$0xff]  ;;  %v427_v26 = vld [vmem:[#allocation3 + $0x30] sm:$0xff]  ;;  %s1777_s16 = sshll.u32 %s413_s15, 4  ;;  %s1779_s21 = sshll.u32 %s1776_s14, 4  ;;  %s1778_s16 = int_to_ptr.vmem [resolvable:$true] %s1777_s16  ;;  %s1780_s21 = int_to_ptr.hbm [resolvable:$true] %s1779_s21 }
  0x29   : > { %518 = vmatpush.msra.mxu1 %v467_v15  ;;  %542 = vmatpush.msra.mxu2 %v465_v17  ;;  %v457_v24 = vld [vmem:[#allocation3 + $0x108] sm:$0xff]  ;;  %v458_v27 = vld [vmem:[#allocation3 + $0x110] sm:$0xff]  ;;  %v456_v29 = vld [vmem:[#allocation3 + $0x100] sm:$0xff]  ;;  %s1765_s22 = scalar_lea.sflag [#allocation5], %s411_s1  ;;  %s2062_s24 = sshra.s32 %s1780_s21, 4  ;;  %s2063_s24 = int_to_ptr.hbm [resolvable:$true] %s2062_s24 }
  0x2a   : > { %496 = vmatpush.msra.mxu0 %v463_v16  ;;  %571 = vmatpush.msra.mxu3 %v433_v18  ;;  %v454_v28 = vld [vmem:[#allocation3 + $0xf0] sm:$0xff]  ;;  %v424_v30 = vld [vmem:[#allocation3 + $0x18] sm:$0xff]  ;;  %v453_v33 = vld [vmem:[#allocation3 + $0xe8] sm:$0xff]  ;;  %s2064_s25 = scalar_lea.hbm %s2063_s24, 32  ;;  %s2068_s19 = scalar_lea.hbm %s2667_s11, 64 }
  0x2b   : > { %519 = vmatpush.msra.mxu1 %v464_v19  ;;  %543 = vmatpush.msra.mxu2 %v462_v21  ;;  %v455_v31 = vld [vmem:[#allocation3 + $0xf8] sm:$0xff]  ;;  %v421_v34 = vld [vmem:[#allocation3] sm:$0xff]  ;;  %v446_v37 = vld [vmem:[#allocation3 + $0xc8] sm:$0xff]  ;;  %p2065_p0 = scmp.ne.s32.totalorder %s2063_s24, %s2064_s25  ;;  %p2069_p3 = scmp.lt.s32.totalorder %s2063_s24, %s2667_s11 }
  0x2c   : > { %497 = vmatpush.msra.mxu0 %v460_v20  ;;  %572 = vmatpush.msra.mxu3 %v430_v22  ;;  %v451_v32 = vld [vmem:[#allocation3 + $0xd8] sm:$0xff]  ;;  %v452_v35 = vld [vmem:[#allocation3 + $0xe0] sm:$0xff]  ;;  %v656_v38 = vld [vmem:[#allocation3 + $0x270] sm:$0xff]  ;;  %p2070_p4 = scmp.lt.s32.totalorder %s2068_s19, %s2064_s25 }
  0x2d   : > { %520 = vmatpush.msra.mxu1 %v461_v23  ;;  %544 = vmatpush.msra.mxu2 %v459_v25  ;;  %v2275_v36 = vld [vmem:[%s2272_s13] sm:$0xff]  ;;  %v447_v41 = vld [vmem:[#allocation3 + $0xd0] sm:$0xff]  ;;  %v654_v44 = vld [vmem:[#allocation3 + $0x260] sm:$0xff]  ;;  %p2066_p1 = pnand %p2065_p0, %p2227_p5 }
  0x2e   : > { %498 = vmatpush.msra.mxu0 %v457_v24  ;;  %573 = vmatpush.msra.mxu3 %v427_v26  ;;  %v657_v39 = vld [vmem:[#allocation3 + $0x278] sm:$0xff]  ;;  %v443_v42 = vld [vmem:[#allocation3 + $0xb0] sm:$0xff]  ;;  %v650_v47 = vld [vmem:[#allocation3 + $0x240] sm:$0xff]  ;;  %p2071_p7 = por %p2070_p4, %p2069_p3 }
  0x2f   : > { %521 = vmatpush.msra.mxu1 %v458_v27  ;;  %545 = vmatpush.msra.mxu2 %v456_v29  ;;  %v448_v40 = vld [vmem:[%s2272_s13 + $0x1] sm:$0xff]  ;;  %v651_v48 = vld [vmem:[#allocation3 + $0x248] sm:$0xff]  ;;  %v648_v52 = vld [vmem:[#allocation3 + $0x230] sm:$0xff]  ;;  %p2067_p2 = pneg %p2066_p1 }
  0x30   : > { %499 = vmatpush.msra.mxu0 %v454_v28  ;;  %574 = vmatpush.msra.mxu3 %v424_v30  ;;  %v653_v43 = vld [vmem:[#allocation3 + $0x258] sm:$0xff]  ;;  %v441_v49 = vld [vmem:[#allocation3 + $0xa0] sm:$0xff]  ;;  %v647_v51 = vld [vmem:[#allocation3 + $0x228] sm:$0xff] }
  0x31   : > { %522 = vmatpush.msra.mxu1 %v455_v31  ;;  %546 = vmatpush.msra.mxu2 %v453_v33  ;;  %v444_v45 = vld [vmem:[#allocation3 + $0xb8] sm:$0xff]  ;;  %v437_v50 = vld [vmem:[#allocation3 + $0x80] sm:$0xff]  ;;  %v438_v53 = vld [vmem:[#allocation3 + $0x88] sm:$0xff]  ;;  %p2072_p8 = pnand %p2071_p7, %p2067_p2 }
  0x32   : > { %500 = vmatpush.msra.mxu0 %v451_v32  ;;  %575 = vmatpush.msra.mxu3 %v421_v34  ;;  %v440_v46 = vld [vmem:[#allocation3 + $0x98] sm:$0xff]  ;;  %v2284_v54 = vld [vmem:[%s2272_s13 + $0x8] sm:$0xff]  ;;  %v434_v55 = vld [vmem:[#allocation3 + $0x68] sm:$0xff] }
  0x33   : > { %523 = vmatpush.msra.mxu1 %v452_v35  ;;  %1880 = vmatmul.msk.f32.vlgmr.msra.gmra.mxu3 %vm478_vm0, %v2275_v36  ;;  %v644_v56 = vld [vmem:[#allocation3 + $0x210] sm:$0xff]  ;;  %v645_v57 = vld [vmem:[#allocation3 + $0x218] sm:$0xff]  ;;  %v449_v58 = vld [vmem:[%s2272_s13 + $0x9] sm:$0xff] }
  0x34   : > { %590 = vmatpush.msrb.mxu0 %v446_v37  ;;  %672 = vmatpush.msrb.mxu2 %v656_v38  ;;  %v435_v59 = vld [vmem:[#allocation3 + $0x70] sm:$0xff]  ;;  %v641_v61 = vld [vmem:[#allocation3 + $0x1f8] sm:$0xff]  ;;  %v642_v62 = vld [vmem:[#allocation3 + $0x200] sm:$0xff] }
  0x35   : > { %695 = vmatpush.msrb.mxu3 %v657_v39  ;;  %1874 = vmatmul.msk.f32.vlgmr.msra.gmra.mxu0 %vm478_vm0, %v448_v40  ;;  %v431_v60 = vld [vmem:[#allocation3 + $0x50] sm:$0xff]  ;;  %v432_v63 = vld [vmem:[#allocation3 + $0x58] sm:$0xff]  ;;  %v638_v1 = vld [vmem:[#allocation3 + $0x1e0] sm:$0xff] }
  0x36   : > { %1878 = vmatmul.msk.f32.vlgmr.msra.gmra.mxu2 %vm478_vm0, %v448_v40  ;;  %613 = vmatpush.msrb.mxu1 %v447_v41  ;;  %v428_v0 = vld [vmem:[#allocation3 + $0x38] sm:$0xff]  ;;  %v639_v2 = vld [vmem:[#allocation3 + $0x1e8] sm:$0xff]  ;;  %v429_v3 = vld [vmem:[#allocation3 + $0x40] sm:$0xff] }
  0x37   : > { %591 = vmatpush.msrb.mxu0 %v443_v42  ;;  %1876 = vmatmul.msk.f32.vlgmr.msra.gmra.mxu1 %vm478_vm0, %v448_v40  ;;  %v425_v4 = vld [vmem:[#allocation3 + $0x20] sm:$0xff]  ;;  %v635_v5 = vld [vmem:[#allocation3 + $0x1c8] sm:$0xff]  ;;  %v636_v6 = vld [vmem:[#allocation3 + $0x1d0] sm:$0xff] }
  0x38   : > { %673 = vmatpush.msrb.mxu2 %v653_v43  ;;  %696 = vmatpush.msrb.mxu3 %v654_v44  ;;  %v426_v7 = vld [vmem:[#allocation3 + $0x28] sm:$0xff]  ;;  %v632_v9 = vld [vmem:[#allocation3 + $0x1b0] sm:$0xff]  ;;  %v633_v10 = vld [vmem:[#allocation3 + $0x1b8] sm:$0xff] }
  0x39   : > { %614 = vmatpush.msrb.mxu1 %v444_v45  ;;  %592 = vmatpush.msrb.mxu0 %v440_v46  ;;  %v422_v8 = vld [vmem:[#allocation3 + $0x8] sm:$0xff]  ;;  %v423_v11 = vld [vmem:[#allocation3 + $0x10] sm:$0xff]  ;;  %v629_v12 = vld [vmem:[%s2272_s13 + $0x2] sm:$0xff] }
  0x3a   : > { %674 = vmatpush.msrb.mxu2 %v650_v47  ;;  %697 = vmatpush.msrb.mxu3 %v651_v48  ;;  %v658_v13 = vld [vmem:[#allocation3 + $0x280] sm:$0xff]  ;;  %v954_v14 = vld [vmem:[#allocation6 + $0x430] sm:$0xff]  ;;  %v655_v15 = vld [vmem:[#allocation3 + $0x268] sm:$0xff] }
  0x3b   : > { %615 = vmatpush.msrb.mxu1 %v441_v49  ;;  %593 = vmatpush.msrb.mxu0 %v437_v50  ;;  %v952_v16 = vld [vmem:[#allocation6 + $0x420] sm:$0xff]  ;;  %v652_v17 = vld [vmem:[#allocation3 + $0x250] sm:$0xff]  ;;  %v950_v18 = vld [vmem:[#allocation6 + $0x410] sm:$0xff] }
  0x3c   : > { %675 = vmatpush.msrb.mxu2 %v647_v51  ;;  %698 = vmatpush.msrb.mxu3 %v648_v52  ;;  %v649_v19 = vld [vmem:[#allocation3 + $0x238] sm:$0xff]  ;;  %v630_v20 = vld [vmem:[%s2272_s13 + $0xa] sm:$0xff]  ;;  %v640_v25 = vld [vmem:[#allocation3 + $0x1f0] sm:$0xff] }
  0x3d   : > { %616 = vmatpush.msrb.mxu1 %v438_v53  ;;  %1881 = vmatmul.msk.f32.gmra.mxu3 %vm478_vm0, %v2284_v54  ;;  %v646_v21 = vld [vmem:[#allocation3 + $0x220] sm:$0xff]  ;;  %v948_v22 = vld [vmem:[#allocation6 + $0x400] sm:$0xff]  ;;  %v946_v24 = vld [vmem:[#allocation6 + $0x3f0] sm:$0xff] }
  0x3e   : > { %594 = vmatpush.msrb.mxu0 %v434_v55  ;;  %676 = vmatpush.msrb.mxu2 %v644_v56  ;;  %v643_v23 = vld [vmem:[#allocation3 + $0x208] sm:$0xff]  ;;  %v637_v27 = vld [vmem:[#allocation3 + $0x1d8] sm:$0xff]  ;;  %v634_v28 = vld [vmem:[#allocation3 + $0x1c0] sm:$0xff] }
  0x3f   : > { %699 = vmatpush.msrb.mxu3 %v645_v57  ;;  %1875 = vmatmul.msk.f32.gmra.mxu0 %vm478_vm0, %v449_v58  ;;  %v944_v26 = vld [vmem:[#allocation6 + $0x3e0] sm:$0xff]  ;;  %v955_v29 = vld [vmem:[#allocation6 + $0x438] sm:$0xff]  ;;  %v942_v30 = vld [vmem:[#allocation6 + $0x3d0] sm:$0xff] }
  0x40   : > { %1879 = vmatmul.msk.f32.gmra.mxu2 %vm478_vm0, %v449_v58  ;;  %617 = vmatpush.msrb.mxu1 %v435_v59  ;;  %v953_v31 = vld [vmem:[#allocation6 + $0x428] sm:$0xff]  ;;  %v940_v32 = vld [vmem:[#allocation6 + $0x3c0] sm:$0xff]  ;;  %v951_v33 = vld [vmem:[#allocation6 + $0x418] sm:$0xff] }
  0x41   : > { %595 = vmatpush.msrb.mxu0 %v431_v60  ;;  %1877 = vmatmul.msk.f32.gmra.mxu1 %vm478_vm0, %v449_v58  ;;  %v938_v34 = vld [vmem:[#allocation6 + $0x3b0] sm:$0xff]  ;;  %v949_v35 = vld [vmem:[#allocation6 + $0x408] sm:$0xff]  ;;  %v947_v37 = vld [vmem:[#allocation6 + $0x3f8] sm:$0xff] }
  0x42   : > { %677 = vmatpush.msrb.mxu2 %v641_v61  ;;  %700 = vmatpush.msrb.mxu3 %v642_v62  ;;  %v934_v38 = vld [vmem:[#allocation6 + $0x390] sm:$0xff]  ;;  %v945_v39 = vld [vmem:[#allocation6 + $0x3e8] sm:$0xff]  ;;  %v932_v40 = vld [vmem:[#allocation6 + $0x380] sm:$0xff] }
  0x43   : > { %618 = vmatpush.msrb.mxu1 %v432_v63  ;;  %596 = vmatpush.msrb.mxu0 %v428_v0  ;;  %v943_v41 = vld [vmem:[#allocation6 + $0x3d8] sm:$0xff]  ;;  %v922_v42 = vld [vmem:[#allocation6 + $0x330] sm:$0xff]  ;;  %v941_v44 = vld [vmem:[#allocation6 + $0x3c8] sm:$0xff] }
  0x44   : > { %678 = vmatpush.msrb.mxu2 %v638_v1  ;;  %701 = vmatpush.msrb.mxu3 %v639_v2  ;;  %v930_v43 = vld [vmem:[#allocation6 + $0x370] sm:$0xff]  ;;  %v920_v45 = vld [vmem:[#allocation6 + $0x320] sm:$0xff]  ;;  %v939_v47 = vld [vmem:[#allocation6 + $0x3b8] sm:$0xff] }
  0x45   : > { %619 = vmatpush.msrb.mxu1 %v429_v3  ;;  %597 = vmatpush.msrb.mxu0 %v425_v4  ;;  %v928_v46 = vld [vmem:[#allocation6 + $0x360] sm:$0xff]  ;;  %v918_v48 = vld [vmem:[#allocation6 + $0x310] sm:$0xff]  ;;  %v937_v50 = vld [vmem:[#allocation6 + $0x3a8] sm:$0xff] }
  0x46   : > { %679 = vmatpush.msrb.mxu2 %v635_v5  ;;  %702 = vmatpush.msrb.mxu3 %v636_v6  ;;  %v926_v49 = vld [vmem:[#allocation6 + $0x350] sm:$0xff]  ;;  %v916_v51 = vld [vmem:[#allocation6 + $0x300] sm:$0xff]  ;;  %v935_v53 = vld [vmem:[#allocation6 + $0x398] sm:$0xff] }
  0x47   : > { %620 = vmatpush.msrb.mxu1 %v426_v7  ;;  %598 = vmatpush.msrb.mxu0 %v422_v8  ;;  %v924_v52 = vld [vmem:[#allocation6 + $0x340] sm:$0xff]  ;;  %v914_v55 = vld [vmem:[#allocation6 + $0x2f0] sm:$0xff]  ;;  %v933_v56 = vld [vmem:[#allocation6 + $0x388] sm:$0xff] }
  0x48   : > { %680 = vmatpush.msrb.mxu2 %v632_v9  ;;  %703 = vmatpush.msrb.mxu3 %v633_v10  ;;  %v841_v57 = vld [vmem:[#allocation6 + $0xe0] sm:$0xff]  ;;  %v931_v59 = vld [vmem:[#allocation6 + $0x378] sm:$0xff]  ;;  %v839_v60 = vld [vmem:[#allocation6 + $0xd0] sm:$0xff] }
  0x49   : > { %1882 = vmatmul.msk.f32.vlgmr.msrb.gmra.mxu0 %vm478_vm0, %v2275_v36  ;;  %621 = vmatpush.msrb.mxu1 %v423_v11  ;;  %v912_v58 = vld [vmem:[#allocation6 + $0x2e0] sm:$0xff]  ;;  %v910_v61 = vld [vmem:[#allocation6 + $0x2d0] sm:$0xff]  ;;  %v929_v62 = vld [vmem:[#allocation6 + $0x368] sm:$0xff] }
  0x4a   : > { %1886 = vmatmul.msk.f32.vlgmr.msrb.gmra.mxu2 %vm478_vm0, %v629_v12  ;;  %1888 = vmatmul.msk.f32.vlgmr.msrb.gmra.mxu3 %vm478_vm0, %v629_v12  ;;  %v837_v63 = vld [vmem:[#allocation6 + $0xc0] sm:$0xff]  ;;  %v927_v1 = vld [vmem:[#allocation6 + $0x358] sm:$0xff]  ;;  %v835_v2 = vld [vmem:[#allocation6 + $0xb0] sm:$0xff] }
  0x4b   : > { %718 = vmatpush.msra.mxu0 %v658_v13  ;;  %1884 = vmatmul.msk.f32.vlgmr.msrb.gmra.mxu1 %vm478_vm0, %v2275_v36  ;;  %v936_v36 = vld [vmem:[#allocation6 + $0x3a0] sm:$0xff]  ;;  %v906_v3 = vld [vmem:[#allocation6 + $0x2b0] sm:$0xff]  ;;  %v925_v4 = vld [vmem:[#allocation6 + $0x348] sm:$0xff] }
  0x4c   : > { %1020 = vmatpush.msra.mxu2 %v954_v14  ;;  %997 = vmatpush.msra.mxu1 %v922_v42  ;;  %v908_v0 = vld [vmem:[#allocation6 + $0x2c0] sm:$0xff]  ;;  %v844_v6 = vld [vmem:[#allocation6 + $0xf8] sm:$0xff]  ;;  %v831_v8 = vld [vmem:[#allocation6 + $0x90] sm:$0xff] }
  0x4d   : > { %719 = vmatpush.msra.mxu0 %v655_v15  ;;  %v833_v5 = vld [vmem:[#allocation6 + $0xa0] sm:$0xff]  ;;  %v842_v9 = vld [vmem:[#allocation6 + $0xe8] sm:$0xff]  ;;  %v902_v10 = vld [vmem:[#allocation6 + $0x290] sm:$0xff] }
  0x4e   : > { %1021 = vmatpush.msra.mxu2 %v952_v16  ;;  %998 = vmatpush.msra.mxu1 %v920_v45  ;;  %v904_v7 = vld [vmem:[#allocation6 + $0x2a0] sm:$0xff]  ;;  %v840_v14 = vld [vmem:[#allocation6 + $0xd8] sm:$0xff]  ;;  %v827_v16 = vld [vmem:[#allocation6 + $0x70] sm:$0xff] }
  0x4f   : > { %720 = vmatpush.msra.mxu0 %v652_v17  ;;  %v829_v13 = vld [vmem:[#allocation6 + $0x80] sm:$0xff]  ;;  %v838_v17 = vld [vmem:[#allocation6 + $0xc8] sm:$0xff] }
  0x50   : > { %1022 = vmatpush.msra.mxu2 %v950_v18  ;;  %999 = vmatpush.msra.mxu1 %v918_v48  ;;  %v900_v15 = vld [vmem:[#allocation6 + $0x280] sm:$0xff]  ;;  %v898_v18 = vld [vmem:[#allocation6 + $0x270] sm:$0xff] }
  0x51   : > { %721 = vmatpush.msra.mxu0 %v649_v19  ;;  %v825_v19 = vld [vmem:[#allocation6 + $0x60] sm:$0xff]  ;;  %v958_v48 = vld [vmem:[#allocation6 + $0x450] sm:$0xff] }
  0x52   : > { %1883 = vmatmul.msk.f32.gmra.mxu0 %vm478_vm0, %v2284_v54  ;;  %1887 = vmatmul.msk.f32.gmra.mxu2 %vm478_vm0, %v630_v20  ;;  %v813_v45 = vld [vmem:[#allocation6] sm:$0xff] }
  0x53   : > { %1889 = vmatmul.msk.f32.gmra.mxu3 %vm478_vm0, %v630_v20  ;;  %722 = vmatpush.msra.mxu0 %v646_v21  ;;  %v896_v21 = vld [vmem:[#allocation6 + $0x260] sm:$0xff] }
  0x54   : > { %1885 = vmatmul.msk.f32.gmra.mxu1 %vm478_vm0, %v2284_v54  ;;  %1023 = vmatpush.msra.mxu2 %v948_v22  ;;  %v843_v54 = vld [vmem:[#allocation6 + $0xf0] sm:$0xff] }
  0x55   : > { %723 = vmatpush.msra.mxu0 %v643_v23  ;;  %1000 = vmatpush.msra.mxu1 %v916_v51  ;;  %v823_v23 = vld [vmem:[#allocation6 + $0x50] sm:$0xff]  ;;  %v956_v51 = vld [vmem:[#allocation6 + $0x440] sm:$0xff] }
  0x56   : > { %1024 = vmatpush.msra.mxu2 %v946_v24  ;;  %v834_v24 = vld [vmem:[#allocation6 + $0xa8] sm:$0xff] }
  0x57   : > { %724 = vmatpush.msra.mxu0 %v640_v25  ;;  %1001 = vmatpush.msra.mxu1 %v914_v55  ;;  %v2330_v55 = vld [vmem:[%s2658_s2] sm:$0x7] }
  0x58   : > { %1025 = vmatpush.msra.mxu2 %v944_v26  ;;  %v894_v26 = vld [vmem:[#allocation6 + $0x250] sm:$0xff] }
  0x59   : > { %725 = vmatpush.msra.mxu0 %v637_v27  ;;  %1002 = vmatpush.msra.mxu1 %v912_v58  ;;  %v821_v27 = vld [vmem:[#allocation6 + $0x40] sm:$0xff]  ;;  %v919_v58 = vld [vmem:[#allocation6 + $0x318] sm:$0xff] }
  0x5a   : > { %1026 = vmatpush.msra.mxu2 %v942_v30 }
  0x5b   : > { %726 = vmatpush.msra.mxu0 %v634_v28  ;;  %1003 = vmatpush.msra.mxu1 %v910_v61  ;;  %v832_v28 = vld [vmem:[#allocation6 + $0x98] sm:$0xff]  ;;  %v917_v61 = vld [vmem:[#allocation6 + $0x308] sm:$0xff] }
  0x5c   : > { %1890 = vmatmul.msk.f32.vlgmr.msra.gmra.mxu0 %vm478_vm0, %v629_v12  ;;  %1027 = vmatpush.msra.mxu2 %v940_v32  ;;  %v2126_v12 = vmov 0.0   ;;  %v819_v32 = vld [vmem:[#allocation6 + $0x30] sm:$0xff] }
  0x5d   : > { %1089 = vmatpush.msrb.mxu0 %v955_v29  ;;  %1004 = vmatpush.msra.mxu1 %v908_v0  ;;  %760 = vst [vmem:[#allocation2] sm:$0xff] %v2126_v12  ;;  %v892_v29 = vld [vmem:[#allocation6 + $0x240] sm:$0xff] }
  0x5e   : > { %1028 = vmatpush.msra.mxu2 %v938_v34  ;;  %761 = vst [vmem:[#allocation2 + $0x8] sm:$0xff] %v2126_v12 }
  0x5f   : > { %1090 = vmatpush.msrb.mxu0 %v953_v31  ;;  %1005 = vmatpush.msra.mxu1 %v906_v3  ;;  %767 = vst [vmem:[#allocation2 + $0x30] sm:$0x3] %v2126_v12  ;;  %v963_v31 = vld [vmem:[#allocation6 + $0x478] sm:$0xff] }
  0x60   : > { %1029 = vmatpush.msra.mxu2 %v936_v36  ;;  %768 = vst [vmem:[#allocation2 + $0x38] sm:$0x3] %v2126_v12  ;;  %v817_v36 = vld [vmem:[#allocation6 + $0x20] sm:$0xff] }
  0x61   : > { %1091 = vmatpush.msrb.mxu0 %v951_v33  ;;  %1006 = vmatpush.msra.mxu1 %v904_v7  ;;  %v830_v33 = vld [vmem:[#allocation6 + $0x88] sm:$0xff]  ;;  %763 = vst.msk [vmem:[#allocation2 + $0x10] sm:$0xff] %vm762_vm1, %v2126_v12 }
  0x62   : > { %1030 = vmatpush.msra.mxu2 %v934_v38  ;;  %v962_v38 = vld [vmem:[#allocation6 + $0x470] sm:$0xff]  ;;  %766 = vst.msk [vmem:[#allocation2 + $0x28] sm:$0xff] %vm762_vm1, %v2126_v12 }
  0x63   : > { %1092 = vmatpush.msrb.mxu0 %v949_v35  ;;  %1007 = vmatpush.msra.mxu1 %v902_v10  ;;  %v961_v35 = vld [vmem:[#allocation6 + $0x468] sm:$0xff]  ;;  %770 = vst.msk [vmem:[#allocation2 + $0x40] sm:$0x3] %vm769_vm2, %v2126_v12  ;;  %v911_v12 = vld [vmem:[#allocation6 + $0x2d8] sm:$0xff] }
  0x64   : > { %1891 = vmatmul.msk.f32.gmra.mxu0 %vm478_vm0, %v630_v20  ;;  %1031 = vmatpush.msra.mxu2 %v932_v40  ;;  %v836_v20 = vld [vmem:[#allocation6 + $0xb8] sm:$0xff]  ;;  %v815_v40 = vld [vmem:[#allocation6 + $0x10] sm:$0xff] }
  0x65   : > { %1093 = vmatpush.msrb.mxu0 %v947_v37  ;;  %1008 = vmatpush.msra.mxu1 %v900_v15  ;;  %v828_v37 = vld [vmem:[#allocation6 + $0x78] sm:$0xff] }
  0x66   : > { %1032 = vmatpush.msra.mxu2 %v930_v43  ;;  %1055 = vmatpush.msra.mxu3 %v962_v38  ;;  %v960_v43 = vld [vmem:[#allocation6 + $0x460] sm:$0xff]  ;;  %v901_v38 = vld [vmem:[#allocation6 + $0x288] sm:$0xff] }
  0x67   : > { %1094 = vmatpush.msrb.mxu0 %v945_v39  ;;  %1009 = vmatpush.msra.mxu1 %v898_v18  ;;  %v959_v39 = vld [vmem:[#allocation6 + $0x458] sm:$0xff] }
  0x68   : > { %1033 = vmatpush.msra.mxu2 %v928_v46  ;;  %1056 = vmatpush.msra.mxu3 %v960_v43 }
  0x69   : > { %1095 = vmatpush.msrb.mxu0 %v943_v41  ;;  %1010 = vmatpush.msra.mxu1 %v896_v21  ;;  %v826_v41 = vld [vmem:[#allocation6 + $0x68] sm:$0xff] }
  0x6a   : > { %1034 = vmatpush.msra.mxu2 %v926_v49  ;;  %v822_v49 = vld [vmem:[#allocation6 + $0x48] sm:$0xff]  ;;  %1057 = vmatpush.msra.mxu3 %v958_v48 }
  0x6b   : > { %1096 = vmatpush.msrb.mxu0 %v941_v44  ;;  %1011 = vmatpush.msra.mxu1 %v894_v26  ;;  %v957_v44 = vld [vmem:[#allocation6 + $0x448] sm:$0xff] }
  0x6c   : > { %1035 = vmatpush.msra.mxu2 %v924_v52  ;;  %v820_v52 = vld [vmem:[#allocation6 + $0x38] sm:$0xff]  ;;  %1058 = vmatpush.msra.mxu3 %v956_v51 }
  0x6d   : > { %1097 = vmatpush.msrb.mxu0 %v939_v47  ;;  %1012 = vmatpush.msra.mxu1 %v892_v29  ;;  %v824_v47 = vld [vmem:[#allocation6 + $0x58] sm:$0xff]  ;;  %v905_v29 = vld [vmem:[#allocation6 + $0x2a8] sm:$0xff] }
  0x6e   : > { %1140 = vmatpush.msrb.mxu2 %v843_v54 }
  0x6f   : > { %1098 = vmatpush.msrb.mxu0 %v937_v50  ;;  %1124 = vmatpush.msrb.mxu1 %v963_v31 }
  0x70   : > { %1141 = vmatpush.msrb.mxu2 %v841_v57  ;;  %v921_v57 = vld [vmem:[#allocation6 + $0x328] sm:$0xff] }
  0x71   : > { %1099 = vmatpush.msrb.mxu0 %v935_v53  ;;  %1125 = vmatpush.msrb.mxu1 %v961_v35  ;;  %v923_v53 = vld [vmem:[#allocation6 + $0x338] sm:$0xff] }
  0x72   : > { %1142 = vmatpush.msrb.mxu2 %v839_v60  ;;  %1066 = vmatpush.msrb.mxu3 %v923_v53  ;;  %v742_v60 = vperm.slane %v2330_v55, 0 }
  0x73   : > { %1100 = vmatpush.msrb.mxu0 %v933_v56  ;;  %1126 = vmatpush.msrb.mxu1 %v959_v39  ;;  %v818_v56 = vld [vmem:[#allocation6 + $0x28] sm:$0xff] }
  0x74   : > { %1143 = vmatpush.msrb.mxu2 %v837_v63  ;;  %1067 = vmatpush.msrb.mxu3 %v921_v57 }
  0x75   : > { %1101 = vmatpush.msrb.mxu0 %v931_v59  ;;  %1127 = vmatpush.msrb.mxu1 %v957_v44 }
  0x76   : > { %1144 = vmatpush.msrb.mxu2 %v835_v2  ;;  %1068 = vmatpush.msrb.mxu3 %v919_v58  ;;  %v814_v2 = vld [vmem:[#allocation6 + $0x8] sm:$0xff] }
  0x77   : > { %1102 = vmatpush.msrb.mxu0 %v929_v62  ;;  %v816_v62 = vld [vmem:[#allocation6 + $0x18] sm:$0xff] }
  0x78   : > { %1145 = vmatpush.msrb.mxu2 %v833_v5  ;;  %v915_v5 = vld [vmem:[#allocation6 + $0x2f8] sm:$0xff]  ;;  %1069 = vmatpush.msrb.mxu3 %v917_v61  ;;  %v874_v61 = vld [vmem:[#allocation6 + $0x1e8] sm:$0xff] }
  0x79   : > { %1103 = vmatpush.msrb.mxu0 %v927_v1  ;;  %v743_v1 = vperm.slane %v2330_v55, 1 }
  0x7a   : > { %1146 = vmatpush.msrb.mxu2 %v831_v8  ;;  %1070 = vmatpush.msrb.mxu3 %v915_v5 }
  0x7b   : > { %1104 = vmatpush.msrb.mxu0 %v925_v4 }
  0x7c   : > { %1147 = vmatpush.msrb.mxu2 %v829_v13 }
  0x7d   : > { %1209 = vmatpush.msra.mxu0 %v844_v6 }
  0x7e   : > { %1148 = vmatpush.msrb.mxu2 %v827_v16 }
  0x7f   : > { %1210 = vmatpush.msra.mxu0 %v842_v9  ;;  %v913_v9 = vld [vmem:[#allocation6 + $0x2e8] sm:$0xff] }
  0x80   : > { %1149 = vmatpush.msrb.mxu2 %v825_v19  ;;  %1071 = vmatpush.msrb.mxu3 %v913_v9  ;;  %v870_v9 = vld [vmem:[#allocation6 + $0x1c8] sm:$0xff] }
  0x81   : > { %1211 = vmatpush.msra.mxu0 %v840_v14 }
  0x82   : > { %1150 = vmatpush.msrb.mxu2 %v823_v23  ;;  %1072 = vmatpush.msrb.mxu3 %v911_v12 }
  0x83   : > { %1212 = vmatpush.msra.mxu0 %v838_v17  ;;  %v909_v17 = vld [vmem:[#allocation6 + $0x2c8] sm:$0xff] }
  0x84   : > { %1151 = vmatpush.msrb.mxu2 %v821_v27  ;;  %1073 = vmatpush.msrb.mxu3 %v909_v17  ;;  %v868_v17 = vld [vmem:[#allocation6 + $0x1b8] sm:$0xff] }
  0x85   : > { %1213 = vmatpush.msra.mxu0 %v836_v20 }
  0x86   : > { %1152 = vmatpush.msrb.mxu2 %v819_v32 }
  0x87   : > { %1214 = vmatpush.msra.mxu0 %v834_v24  ;;  %v907_v24 = vld [vmem:[#allocation6 + $0x2b8] sm:$0xff] }
  0x88   : > { %1153 = vmatpush.msrb.mxu2 %v817_v36  ;;  %1074 = vmatpush.msrb.mxu3 %v907_v24 }
  0x89   : > { %1215 = vmatpush.msra.mxu0 %v832_v28  ;;  %v744_v28 = vperm.slane %v2330_v55, 2  ;;  %v875_v55 = vld [vmem:[#allocation6 + $0x1f0] sm:$0xff] }
  0x8a   : > { %1154 = vmatpush.msrb.mxu2 %v815_v40  ;;  %1075 = vmatpush.msrb.mxu3 %v905_v29  ;;  %v860_v29 = vld [vmem:[#allocation6 + $0x178] sm:$0xff] }
  0x8b   : > { %1216 = vmatpush.msra.mxu0 %v830_v33 }
  0x8c   : > { %1155 = vmatpush.msrb.mxu2 %v813_v45 }
  0x8d   : > { %1217 = vmatpush.msra.mxu0 %v828_v37 }
  0x8f   : > { %1218 = vmatpush.msra.mxu0 %v826_v41 }
  0x91   : > { %1219 = vmatpush.msra.mxu0 %v824_v47 }
  0x93   : > { %1220 = vmatpush.msra.mxu0 %v822_v49  ;;  %v899_v49 = vld [vmem:[#allocation6 + $0x278] sm:$0xff] }
  0x95   : > { %1221 = vmatpush.msra.mxu0 %v820_v52 }
  0x97   : > { %1222 = vmatpush.msra.mxu0 %v818_v56  ;;  %v876_v56 = vld [vmem:[#allocation6 + $0x1f8] sm:$0xff] }
  0x99   : > { %1223 = vmatpush.msra.mxu0 %v816_v62 }
  0x9b   : > { %1224 = vmatpush.msra.mxu0 %v814_v2  ;;  %v872_v2 = vld [vmem:[#allocation6 + $0x1d8] sm:$0xff] }
  0xb2   : > { %v2308_v11 = vpop.f32.mrf.mxu0 }
  0xb4   : > { %v525_v34 = vpop.f32.mrf.mxu1 }
  0xb6   : > { %v2316_v25 = vpop.f32.mrf.mxu3 }
  0xb7   : > { %v578_v59 = vadd.f32 %v2316_v25, %v2308_v11 }
  0xb9   : > { %v2314_v22 = vpop.f32.mrf.mxu2 }
  0xbc   : > { %v2318_v30 = vpop.f32.mrf.mxu0 }
  0xbe   : > { %v528_v54 = vpop.f32.mrf.mxu1 }
  0xc0   : > { %v580_v46 = vpop.f32.mrf.mxu3 }
  0xc1   : > { %v581_v15 = vadd.f32 %v580_v46, %v2318_v30 }
  0xc3   : > { %v2322_v42 = vpop.f32.mrf.mxu2 }
  0xc6   : > { %v600_v50 = vpop.f32.mrf.mxu0 }
  0xc7   : > { %v601_v63 = vadd.f32 %v600_v50, %v525_v34  ;;  %v903_v34 = vld [vmem:[#allocation6 + $0x298] sm:$0xff] }
  0xc8   : > { %v623_v13 = vpop.f32.mrf.mxu1  ;;  %1076 = vmatpush.msrb.mxu3 %v903_v34  ;;  %v857_v34 = vld [vmem:[#allocation6 + $0x160] sm:$0xff] }
  0xc9   : > { %v624_v26 = vadd.f32 %v623_v13, %v2314_v22  ;;  %v1349_v13 = vld [vmem:[#allocation6 + $0x680] sm:$0xff] }
  0xca   : > { %1077 = vmatpush.msrb.mxu3 %v901_v38 }
  0xcc   : > { %1078 = vmatpush.msrb.mxu3 %v899_v49  ;;  %v1342_v49 = vld [vmem:[#allocation6 + $0x648] sm:$0xff] }
  0xcd   : > { %v682_v0 = vpop.f32.mrf.mxu2  ;;  %v705_v4 = vpop.f32.mrf.mxu3 }
  0xce   : > { %v734_v3 = vadd.f32 %v682_v0, %v578_v59  ;;  %v735_v6 = vadd.f32 %v705_v4, %v601_v63  ;;  %v1355_v59 = vld [vmem:[#allocation6 + $0x6b0] sm:$0xff]  ;;  %v1353_v63 = vld [vmem:[#allocation6 + $0x6a0] sm:$0xff]  ;;  %v895_v0 = vld [vmem:[#allocation6 + $0x258] sm:$0xff] }
  0xcf   : > { %v603_v7 = vpop.f32.mrf.mxu0 }
  0xd0   : > { %v748_v8 = vadd.f32 %v742_v60, %v734_v3  ;;  %v749_v10 = vadd.f32 %v743_v1, %v735_v6  ;;  %v604_v19 = vadd.f32 %v603_v7, %v528_v54  ;;  %v1351_v6 = vld [vmem:[#allocation6 + $0x690] sm:$0xff]  ;;  %v893_v7 = vld [vmem:[#allocation6 + $0x248] sm:$0xff] }
  0xd1   : > { %v626_v39 = vpop.f32.mrf.mxu1 }
  0xd2   : > { %v754_v11 = vmax.f32 %v748_v8, 0.0  ;;  %v755_v14 = vmax.f32 %v749_v10, 0.0  ;;  %v627_v50 = vadd.f32 %v626_v39, %v2322_v42  ;;  %v873_v42 = vld [vmem:[#allocation6 + $0x1e0] sm:$0xff]  ;;  %v1346_v39 = vld [vmem:[#allocation6 + $0x668] sm:$0xff] }
  0xd3   : > { %v869_v8 = vld [vmem:[#allocation6 + $0x1c0] sm:$0xff] }
  0xd4   : > { %v778_v16 = vrot.slane %v754_v11, 7  ;;  %v779_v18 = vrot.slane %v755_v14, 7 }
  0xd5   : > { %v685_v20 = vpop.f32.mrf.mxu2 }
  0xd6   : > { %796 = vst [vmem:[#allocation2] sm:$0xfe] %v778_v16  ;;  %v737_v21 = vadd.f32 %v685_v20, %v581_v15  ;;  %v708_v23 = vpop.f32.mrf.mxu3  ;;  %v866_v20 = vld [vmem:[#allocation6 + $0x1a8] sm:$0xff] }
  0xd7   : > { %797 = vst [vmem:[#allocation2 + $0x8] sm:$0xfe] %v779_v18  ;;  %v738_v25 = vadd.f32 %v708_v23, %v604_v19  ;;  %v865_v19 = vld [vmem:[#allocation6 + $0x1a0] sm:$0xff]  ;;  %v864_v23 = vld [vmem:[#allocation6 + $0x198] sm:$0xff] }
  0xd8   : > { %v751_v27 = vadd.f32 %v742_v60, %v737_v21  ;;  %v897_v60 = vld [vmem:[#allocation6 + $0x268] sm:$0xff]  ;;  %v863_v21 = vld [vmem:[#allocation6 + $0x190] sm:$0xff] }
  0xd9   : > { %v752_v30 = vadd.f32 %v743_v1, %v738_v25  ;;  %v728_v31 = vpop.f32.mrf.mxu0  ;;  %v871_v1 = vld [vmem:[#allocation6 + $0x1d0] sm:$0xff]  ;;  %1079 = vmatpush.msrb.mxu3 %v897_v60  ;;  %v861_v25 = vld [vmem:[#allocation6 + $0x180] sm:$0xff] }
  0xda   : > { %v757_v32 = vmax.f32 %v751_v27, 0.0  ;;  %v736_v33 = vadd.f32 %v728_v31, %v624_v26  ;;  %v862_v26 = vld [vmem:[#allocation6 + $0x188] sm:$0xff]  ;;  %v847_v60 = vld [vmem:[#allocation6 + $0x110] sm:$0xff] }
  0xdb   : > { %v758_v35 = vmax.f32 %v752_v30, 0.0  ;;  %1080 = vmatpush.msrb.mxu3 %v895_v0  ;;  %v1315_v0 = vld [vmem:[#allocation6 + $0x570] sm:$0xff] }
  0xdc   : > { %v781_v36 = vrot.slane %v757_v32, 7  ;;  %v750_v37 = vadd.f32 %v744_v28, %v736_v33  ;;  %v1348_v33 = vld [vmem:[#allocation6 + $0x678] sm:$0xff] }
  0xdd   : > { %v783_v40 = vrot.slane %v758_v35, 7  ;;  %v885_v41 = vld [vmem:[#allocation2] sm:$0xfe]  ;;  %1081 = vmatpush.msrb.mxu3 %v893_v7 }
  0xde   : > { %v2340_v22 = vsel %vm777_vm3, %v778_v16, %v781_v36  ;;  %803 = vst [vmem:[#allocation2 + $0x30] sm:$0x1] %v781_v36  ;;  %v756_v43 = vmax.f32 %v750_v37, 0.0  ;;  %v974_v44 = vrot.slane %v885_v41, 1  ;;  %v886_v45 = vld [vmem:[#allocation2 + $0x8] sm:$0xfe] }
  0xdf   : > { %v2343_v46 = vsel %vm777_vm3, %v779_v18, %v783_v40  ;;  %v975_v47 = vrot.slane %v2340_v22, 1  ;;  %v977_v48 = vrot.slane %v886_v45, 1  ;;  %804 = vst [vmem:[#allocation2 + $0x38] sm:$0x1] %v783_v40  ;;  %v867_v16 = vld [vmem:[#allocation6 + $0x1b0] sm:$0xff]  ;;  %v858_v36 = vld [vmem:[#allocation6 + $0x168] sm:$0xff] }
  0xe0   : > { %v780_v51 = vrot.slane %v756_v43, 7  ;;  %v978_v52 = vrot.slane %v2343_v46, 1  ;;  %v807_v32 = vld [vmem:[#allocation2] sm:$0xff]  ;;  %v856_v41 = vld [vmem:[#allocation6 + $0x158] sm:$0xff]  ;;  %v881_v43 = vld [vmem:[#allocation6 + $0x220] sm:$0xff] }
  0xe1   : > { %v731_v53 = vpop.f32.mrf.mxu0  ;;  %v2349_v54 = vsel %vm973_vm4, %v974_v44, %v975_v47  ;;  %v883_v37 = vld [vmem:[#allocation6 + $0x230] sm:$0xff]  ;;  %v1344_v44 = vld [vmem:[#allocation6 + $0x658] sm:$0xff]  ;;  %v853_v45 = vld [vmem:[#allocation6 + $0x140] sm:$0xff] }
  0xe2   : > { %799 = vst.msk [vmem:[#allocation2 + $0x10] sm:$0xfe] %vm798_vm5, %v780_v51  ;;  %v739_v57 = vadd.f32 %v731_v53, %v627_v50  ;;  %1013 = vmatmul.f32.vlgmr.msra.gmra.mxu1 %v2349_v54  ;;  %v979_v58 = vsel %vm973_vm4, %v977_v48, %v978_v52  ;;  %v855_v40 = vld [vmem:[#allocation6 + $0x150] sm:$0xff]  ;;  %v854_v48 = vld [vmem:[#allocation6 + $0x148] sm:$0xff]  ;;  %v1340_v53 = vld [vmem:[#allocation6 + $0x638] sm:$0xff] }
  0xe3   : > { %1036 = vmatmul.f32.vlgmr.msra.gmra.mxu2 %v979_v58  ;;  %1105 = vmatmul.f32.vlgmr.msrb.gmra.mxu0 %v979_v58  ;;  %v851_v50 = vld [vmem:[#allocation6 + $0x130] sm:$0xff]  ;;  %v1338_v58 = vld [vmem:[#allocation6 + $0x628] sm:$0xff]  ;;  %v808_v7 = vld [vmem:[#allocation2 + $0x8] sm:$0xff] }
  0xe4   : > { %v753_v62 = vadd.f32 %v744_v28, %v739_v57  ;;  %1163 = vmatpush.msra.mxu1 %v875_v55  ;;  %1232 = vmatpush.msra.mxu2 %v876_v56  ;;  %v859_v28 = vld [vmem:[#allocation6 + $0x170] sm:$0xff]  ;;  %v849_v56 = vld [vmem:[#allocation6 + $0x120] sm:$0xff]  ;;  %v850_v57 = vld [vmem:[#allocation6 + $0x128] sm:$0xff] }
  0xe5   : > { %v888_v3 = vld [vmem:[#allocation2 + $0x30] sm:$0x1]  ;;  %1445 = vmatpush.msrb.mxu0 %v1355_v59  ;;  %v879_v55 = vld [vmem:[#allocation6 + $0x210] sm:$0xff] }
  0xe6   : > { %v759_v4 = vmax.f32 %v753_v62, 0.0  ;;  %1164 = vmatpush.msra.mxu1 %v873_v42  ;;  %1233 = vmatpush.msra.mxu2 %v874_v61  ;;  %v983_v5 = vrot.slane %v888_v3, 1  ;;  %v889_v12 = vld [vmem:[#allocation2 + $0x38] sm:$0x1]  ;;  %v877_v59 = vld [vmem:[#allocation6 + $0x200] sm:$0xff]  ;;  %v848_v42 = vld [vmem:[#allocation6 + $0x118] sm:$0xff] }
  0xe7   : > { %1446 = vmatpush.msrb.mxu0 %v1353_v63  ;;  %v985_v14 = vrot.slane %v889_v12, 1  ;;  %v1336_v61 = vld [vmem:[#allocation6 + $0x618] sm:$0xff]  ;;  %v845_v62 = vld [vmem:[#allocation6 + $0x100] sm:$0xff]  ;;  %v846_v63 = vld [vmem:[#allocation6 + $0x108] sm:$0xff] }
  0xe8   : > { %v785_v10 = vrot.slane %v759_v4, 7  ;;  %1165 = vmatpush.msra.mxu1 %v871_v1  ;;  %1234 = vmatpush.msra.mxu2 %v872_v2  ;;  %v2354_v11 = vsel %vm973_vm4, %v975_v47, %v983_v5  ;;  %v1316_v2 = vld [vmem:[#allocation6 + $0x578] sm:$0xff]  ;;  %v1334_v3 = vld [vmem:[#allocation6 + $0x608] sm:$0xff]  ;;  %v1311_v12 = vld [vmem:[#allocation6 + $0x550] sm:$0xff] }
  0xe9   : > { %1447 = vmatpush.msrb.mxu0 %v1351_v6  ;;  %v986_v18 = vsel %vm973_vm4, %v978_v52, %v985_v14  ;;  %v887_v24 = vld [vmem:[#allocation2 + $0x10] sm:$0xfe]  ;;  %v1330_v14 = vld [vmem:[#allocation6 + $0x5e8] sm:$0xff] }
  0xea   : > { %v786_v15 = vsel %vm777_vm3, %v780_v51, %v785_v10  ;;  %806 = vst.msk [vmem:[#allocation2 + $0x40] sm:$0x1] %vm805_vm6, %v785_v10  ;;  %1166 = vmatpush.msra.mxu1 %v869_v8  ;;  %1235 = vmatpush.msra.mxu2 %v870_v9  ;;  %v980_v30 = vrot.slane %v887_v24, 1  ;;  %v852_v51 = vld [vmem:[#allocation6 + $0x138] sm:$0xff]  ;;  %v1280_v1 = vld [vmem:[#allocation2 + $0x10] sm:$0xfc] }
  0xeb   : > { %802 = vst.msk [vmem:[#allocation2 + $0x28] sm:$0xff] %vm762_vm1, %v786_v15  ;;  %1016 = vmatmul.f32.gmra.mxu1 %v2354_v11  ;;  %1448 = vmatpush.msrb.mxu0 %v1349_v13  ;;  %v1370_v5 = vrot.slane %v1280_v1, 2  ;;  %v1313_v6 = vld [vmem:[#allocation6 + $0x560] sm:$0xff]  ;;  %v1314_v8 = vld [vmem:[#allocation6 + $0x568] sm:$0xff]  ;;  %v1332_v9 = vld [vmem:[#allocation6 + $0x5f8] sm:$0xff] }
  0xec   : > { %1039 = vmatmul.f32.gmra.mxu2 %v986_v18  ;;  %1108 = vmatmul.f32.gmra.mxu0 %v986_v18  ;;  %v884_v13 = vld [vmem:[#allocation6 + $0x238] sm:$0xff]  ;;  %v1309_v15 = vld [vmem:[#allocation6 + $0x540] sm:$0xff]  ;;  %v1310_v18 = vld [vmem:[#allocation6 + $0x548] sm:$0xff] }
  0xed   : > { %1167 = vmatpush.msra.mxu1 %v867_v16  ;;  %1236 = vmatpush.msra.mxu2 %v868_v17  ;;  %v882_v16 = vld [vmem:[#allocation6 + $0x228] sm:$0xff] }
  0xee   : > { %v1326_v24 = vld [vmem:[#allocation6 + $0x5c8] sm:$0xff] }
  0xef   : > { %1168 = vmatpush.msra.mxu1 %v865_v19  ;;  %1237 = vmatpush.msra.mxu2 %v866_v20  ;;  %v1328_v19 = vld [vmem:[#allocation6 + $0x5d8] sm:$0xff]  ;;  %v1307_v20 = vld [vmem:[#allocation6 + $0x530] sm:$0xff]  ;;  %v1290_v1 = vld [vmem:[#allocation6 + $0x4a8] sm:$0xff] }
  0xf1   : > { %1169 = vmatpush.msra.mxu1 %v863_v21  ;;  %1238 = vmatpush.msra.mxu2 %v864_v23  ;;  %v890_v38 = vld [vmem:[#allocation2 + $0x40] sm:$0x1]  ;;  %v1308_v21 = vld [vmem:[#allocation6 + $0x538] sm:$0xff] }
  0xf2   : > { %v2360_v27 = vld [vmem:[#allocation2 + $0x28] sm:$0xff]  ;;  %v987_v47 = vrot.slane %v890_v38, 1  ;;  %v1283_v17 = vld [vmem:[#allocation2 + $0x40] sm:$0x3]  ;;  %v1302_v38 = vld [vmem:[#allocation6 + $0x508] sm:$0xff] }
  0xf3   : > { %v981_v31 = vrot.slane %v2360_v27, 1  ;;  %1170 = vmatpush.msra.mxu1 %v861_v25  ;;  %1239 = vmatpush.msra.mxu2 %v862_v26  ;;  %v1371_v4 = vrot.slane %v2360_v27, 2  ;;  %v1377_v23 = vrot.slane %v1283_v17, 2  ;;  %v880_v25 = vld [vmem:[#allocation6 + $0x218] sm:$0xff]  ;;  %v1305_v26 = vld [vmem:[#allocation6 + $0x520] sm:$0xff] }
  0xf4   : > { %1156 = vmatmul.f32.vlgmr.msrb.gmra.mxu2 %v807_v32  ;;  %1225 = vmatmul.f32.vlgmr.msra.gmra.mxu0 %v807_v32  ;;  %v1304_v32 = vld [vmem:[#allocation6 + $0x518] sm:$0xff]  ;;  %v1325_v17 = vld [vmem:[#allocation6 + $0x5c0] sm:$0xff] }
  0xf5   : > { %v982_v35 = vsel %vm973_vm4, %v980_v30, %v981_v31  ;;  %1171 = vmatpush.msra.mxu1 %v859_v28  ;;  %1240 = vmatpush.msra.mxu2 %v860_v29  ;;  %v988_v52 = vsel %vm973_vm4, %v981_v31, %v987_v47  ;;  %v2374_v10 = vsel %vm1363_vm7, %v1370_v5, %v1371_v4  ;;  %v1306_v28 = vld [vmem:[#allocation6 + $0x528] sm:$0xff]  ;;  %v1324_v30 = vld [vmem:[#allocation6 + $0x5b8] sm:$0xff] }
  0xf6   : > { %1892 = vmatmul.msk.f32.vlgmr.msra.gmra.mxu3 %vm762_vm1, %v982_v35  ;;  %1894 = vmatmul.msk.f32.vlgmr.msrb.gmra.mxu1 %vm762_vm1, %v982_v35  ;;  %v2382_v29 = vsel %vm1363_vm7, %v1371_v4, %v1377_v23  ;;  %v878_v31 = vld [vmem:[#allocation6 + $0x208] sm:$0xff]  ;;  %v1347_v35 = vld [vmem:[#allocation6 + $0x670] sm:$0xff]  ;;  %v1288_v5 = vld [vmem:[#allocation6 + $0x498] sm:$0xff] }
  0xf7   : > { %1479 = vmatpush.msra.mxu0 %v1348_v33  ;;  %1172 = vmatpush.msra.mxu1 %v857_v34  ;;  %v1322_v33 = vld [vmem:[#allocation6 + $0x5a8] sm:$0xff]  ;;  %v1279_v34 = vld [vmem:[#allocation2 + $0x8] sm:$0xfc]  ;;  %v1287_v4 = vld [vmem:[#allocation6 + $0x490] sm:$0xff] }
  0xf8   : > { %1241 = vmatpush.msra.mxu2 %v858_v36  ;;  %1198 = vmatpush.msra.mxu3 %v883_v37  ;;  %v1301_v36 = vld [vmem:[#allocation6 + $0x500] sm:$0xff]  ;;  %v1318_v47 = vld [vmem:[#allocation6 + $0x588] sm:$0xff] }
  0xf9   : > { %1480 = vmatpush.msra.mxu0 %v1346_v39  ;;  %1173 = vmatpush.msra.mxu1 %v855_v40  ;;  %v2386_v37 = vld [vmem:[#allocation2 + $0x10] sm:$0xff]  ;;  %v1320_v39 = vld [vmem:[#allocation6 + $0x598] sm:$0xff] }
  0xfa   : > { %1242 = vmatpush.msra.mxu2 %v856_v41  ;;  %1199 = vmatpush.msra.mxu3 %v881_v43  ;;  %v1345_v40 = vld [vmem:[#allocation6 + $0x660] sm:$0xff]  ;;  %v1299_v41 = vld [vmem:[#allocation6 + $0x4f0] sm:$0xff]  ;;  %v1367_v43 = vrot.slane %v1279_v34, 2 }
  0xfb   : > { %1481 = vmatpush.msra.mxu0 %v1344_v44  ;;  %1174 = vmatpush.msra.mxu1 %v853_v45  ;;  %v1368_v44 = vrot.slane %v2343_v46, 2  ;;  %v1300_v45 = vld [vmem:[#allocation6 + $0x4f8] sm:$0xff] }
  0xfc   : > { %1243 = vmatpush.msra.mxu2 %v854_v48  ;;  %1228 = vmatmul.f32.gmra.mxu0 %v2340_v22  ;;  %v1343_v48 = vld [vmem:[#allocation6 + $0x650] sm:$0xff] }
  0xfd   : > { %1482 = vmatpush.msra.mxu0 %v1342_v49  ;;  %1159 = vmatmul.f32.gmra.mxu2 %v2340_v22  ;;  %v1297_v49 = vld [vmem:[#allocation6 + $0x4e0] sm:$0xff] }
  0xfe   : > { %1893 = vmatmul.msk.f32.gmra.mxu3 %vm762_vm1, %v988_v52  ;;  %1895 = vmatmul.msk.f32.gmra.mxu1 %vm762_vm1, %v988_v52  ;;  %v1341_v52 = vld [vmem:[#allocation6 + $0x640] sm:$0xff] }
  0xff   : > { %1175 = vmatpush.msra.mxu1 %v851_v50  ;;  %1244 = vmatpush.msra.mxu2 %v852_v51  ;;  %v1298_v50 = vld [vmem:[#allocation6 + $0x4e8] sm:$0xff]  ;;  %v2392_v51 = vsel %vm1363_vm7, %v1367_v43, %v1368_v44 }
 0x100   : > { %1483 = vmatpush.msra.mxu0 %v1340_v53  ;;  %1200 = vmatpush.msra.mxu3 %v879_v55  ;;  %v1296_v53 = vld [vmem:[#allocation6 + $0x4d8] sm:$0xff]  ;;  %v1339_v55 = vld [vmem:[#allocation6 + $0x630] sm:$0xff] }
 0x101   : > { %1176 = vmatpush.msra.mxu1 %v849_v56  ;;  %1245 = vmatpush.msra.mxu2 %v850_v57  ;;  %v1282_v56 = vld [vmem:[#allocation2 + $0x38] sm:$0x3]  ;;  %v1293_v57 = vld [vmem:[#allocation6 + $0x4c0] sm:$0xff] }
 0x102   : > { %1484 = vmatpush.msra.mxu0 %v1338_v58  ;;  %1201 = vmatpush.msra.mxu3 %v877_v59  ;;  %v1294_v58 = vld [vmem:[#allocation6 + $0x4c8] sm:$0xff]  ;;  %v1337_v59 = vld [vmem:[#allocation6 + $0x620] sm:$0xff] }
 0x103   : > { %1177 = vmatpush.msra.mxu1 %v847_v60  ;;  %1246 = vmatpush.msra.mxu2 %v848_v42  ;;  %v1291_v60 = vld [vmem:[#allocation6 + $0x4b0] sm:$0xff]  ;;  %v1375_v42 = vrot.slane %v1282_v56, 2 }
 0x104   : > { %1485 = vmatpush.msra.mxu0 %v1336_v61  ;;  %v1292_v61 = vld [vmem:[#allocation6 + $0x4b8] sm:$0xff] }
 0x105   : > { %1178 = vmatpush.msra.mxu1 %v845_v62  ;;  %1247 = vmatpush.msra.mxu2 %v846_v63  ;;  %v1335_v62 = vld [vmem:[#allocation6 + $0x610] sm:$0xff]  ;;  %v1289_v63 = vld [vmem:[#allocation6 + $0x4a0] sm:$0xff] }
 0x106   : > { %1082 = vmatmul.f32.vlgmr.msrb.gmra.mxu3 %v2349_v54  ;;  %1486 = vmatpush.msra.mxu0 %v1334_v3  ;;  %v1312_v54 = vld [vmem:[#allocation6 + $0x558] sm:$0xff]  ;;  %v1376_v3 = vsel %vm1363_vm7, %v1368_v44, %v1375_v42 }
 0x107   : > { %1387 = vmatpush.msrb.mxu1 %v1315_v0  ;;  %1456 = vmatpush.msrb.mxu2 %v1316_v2  ;;  %v1278_v0 = vld [vmem:[#allocation2] sm:$0xfc]  ;;  %v1333_v2 = vld [vmem:[#allocation6 + $0x600] sm:$0xff] }
 0x108   : > { %1179 = vmatmul.f32.vlgmr.msra.gmra.mxu1 %v808_v7  ;;  %1248 = vmatmul.f32.vlgmr.msra.gmra.mxu2 %v808_v7  ;;  %v1364_v7 = vrot.slane %v1278_v0, 2 }
 0x109   : > { %1900 = vmatmul.msk.f32.vlgmr.msrb.gmra.mxu0 %vm762_vm1, %v2374_v10  ;;  %1388 = vmatpush.msrb.mxu1 %v1313_v6  ;;  %v1331_v6 = vld [vmem:[#allocation6 + $0x5f0] sm:$0xff] }
 0x10a   : > { %1457 = vmatpush.msrb.mxu2 %v1314_v8  ;;  %1487 = vmatpush.msra.mxu0 %v1332_v9  ;;  %v1365_v8 = vrot.slane %v2340_v22, 2  ;;  %v1285_v9 = vld [vmem:[#allocation6 + $0x480] sm:$0xff]  ;;  %v1354_v22 = vld [vmem:[#allocation6 + $0x6a8] sm:$0xff] }
 0x10b   : > { %1389 = vmatpush.msrb.mxu1 %v1311_v12  ;;  %1267 = vmatpush.msrb.mxu3 %v884_v13  ;;  %v1286_v12 = vld [vmem:[#allocation6 + $0x488] sm:$0xff]  ;;  %v1329_v13 = vld [vmem:[#allocation6 + $0x5e0] sm:$0xff] }
 0x10c   : > { %1458 = vmatpush.msrb.mxu2 %v1312_v54  ;;  %1488 = vmatpush.msra.mxu0 %v1330_v14  ;;  %v1366_v54 = vsel %vm1363_vm7, %v1364_v7, %v1365_v8  ;;  %v1356_v14 = vld [vmem:[#allocation6 + $0x6b8] sm:$0xff] }
 0x10d   : > { %1390 = vmatpush.msrb.mxu1 %v1309_v15  ;;  %1268 = vmatpush.msrb.mxu3 %v882_v16  ;;  %v1327_v15 = vld [vmem:[#allocation6 + $0x5d0] sm:$0xff]  ;;  %v1281_v16 = vld [vmem:[#allocation2 + $0x30] sm:$0x3] }
 0x10e   : > { %1085 = vmatmul.f32.gmra.mxu3 %v2354_v11  ;;  %1459 = vmatpush.msrb.mxu2 %v1310_v18  ;;  %v1303_v11 = vld [vmem:[#allocation6 + $0x510] sm:$0xff]  ;;  %v1373_v18 = vrot.slane %v1281_v16, 2 }
 0x10f   : > { %1489 = vmatpush.msra.mxu0 %v1328_v19  ;;  %1391 = vmatpush.msrb.mxu1 %v1307_v20  ;;  %v1352_v19 = vld [vmem:[#allocation6 + $0x698] sm:$0xff]  ;;  %v1323_v20 = vld [vmem:[#allocation6 + $0x5b0] sm:$0xff] }
 0x110   : > { %1460 = vmatpush.msrb.mxu2 %v1308_v21  ;;  %1182 = vmatmul.f32.gmra.mxu1 %v2343_v46  ;;  %v1321_v21 = vld [vmem:[#allocation6 + $0x5a0] sm:$0xff]  ;;  %v1374_v23 = vsel %vm1363_vm7, %v1365_v8, %v1373_v18 }
 0x111   : > { %1490 = vmatpush.msra.mxu0 %v1326_v24  ;;  %1251 = vmatmul.f32.gmra.mxu2 %v2343_v46  ;;  %v1295_v46 = vld [vmem:[#allocation6 + $0x4d0] sm:$0xff]  ;;  %v1350_v24 = vld [vmem:[#allocation6 + $0x688] sm:$0xff]  ;;  %v1567_v8 = vld [vmem:[%s2665_s9 + $0x50] sm:$0xff] }
 0x112   : > { %1901 = vmatmul.msk.f32.gmra.mxu0 %vm762_vm1, %v2382_v29  ;;  %1269 = vmatpush.msrb.mxu3 %v880_v25  ;;  %v1319_v25 = vld [vmem:[#allocation6 + $0x590] sm:$0xff] }
 0x113   : > { %1392 = vmatpush.msrb.mxu1 %v1305_v26  ;;  %1461 = vmatpush.msrb.mxu2 %v1306_v28  ;;  %v1317_v26 = vld [vmem:[#allocation6 + $0x580] sm:$0xff] }
 0x114   : > { %1491 = vmatpush.msra.mxu0 %v1324_v30  ;;  %1270 = vmatpush.msrb.mxu3 %v878_v31 }
 0x115   : > { %1393 = vmatpush.msrb.mxu1 %v1303_v11  ;;  %1462 = vmatpush.msrb.mxu2 %v1304_v32 }
 0x116   : > { %1896 = vmatmul.msk.f32.vlgmr.msra.gmra.mxu3 %vm762_vm1, %v2386_v37  ;;  %1492 = vmatpush.msra.mxu0 %v1322_v33 }
 0x117   : > { %1410 = vmatpush.msra.mxu3 %v1347_v35  ;;  %1394 = vmatpush.msrb.mxu1 %v1301_v36 }
 0x118   : > { %1463 = vmatpush.msrb.mxu2 %v1302_v38  ;;  %1493 = vmatpush.msra.mxu0 %v1320_v39 }
 0x119   : > { %1411 = vmatpush.msra.mxu3 %v1345_v40  ;;  %1395 = vmatpush.msrb.mxu1 %v1299_v41 }
 0x11a   : > { %1464 = vmatpush.msrb.mxu2 %v1300_v45  ;;  %1494 = vmatpush.msra.mxu0 %v1318_v47  ;;  %v1588_v45 = vld [vmem:[%s2665_s9 + $0xf8] sm:$0xff]  ;;  %v1587_v47 = vld [vmem:[%s2665_s9 + $0xf0] sm:$0xff] }
 0x11b   : > { %1412 = vmatpush.msra.mxu3 %v1343_v48  ;;  %1495 = vmatmul.f32.vlgmr.msra.gmra.mxu0 %v2392_v51 }
 0x11c   : > { %1396 = vmatpush.msrb.mxu1 %v1297_v49  ;;  %1465 = vmatpush.msrb.mxu2 %v1298_v50  ;;  %v1586_v49 = vld [vmem:[%s2665_s9 + $0xe8] sm:$0xff]  ;;  %v1585_v50 = vld [vmem:[%s2665_s9 + $0xe0] sm:$0xff] }
 0x11d   : > { %1413 = vmatpush.msra.mxu3 %v1341_v52 }
 0x11e   : > { %1897 = vmatmul.msk.f32.gmra.mxu3 %vm762_vm1, %v2360_v27  ;;  %1397 = vmatpush.msrb.mxu1 %v1295_v46 }
 0x11f   : > { %1466 = vmatpush.msrb.mxu2 %v1296_v53  ;;  %1414 = vmatpush.msra.mxu3 %v1339_v55  ;;  %v1584_v53 = vld [vmem:[%s2665_s9 + $0xd8] sm:$0xff]  ;;  %v1583_v55 = vld [vmem:[%s2665_s9 + $0xd0] sm:$0xff] }
 0x120   : > { %1398 = vmatpush.msrb.mxu1 %v1293_v57  ;;  %v1582_v57 = vld [vmem:[%s2665_s9 + $0xc8] sm:$0xff] }
 0x121   : > { %1467 = vmatpush.msrb.mxu2 %v1294_v58  ;;  %1415 = vmatpush.msra.mxu3 %v1337_v59  ;;  %v1572_v58 = vld [vmem:[%s2665_s9 + $0x78] sm:$0xff]  ;;  %v1571_v59 = vld [vmem:[%s2665_s9 + $0x70] sm:$0xff] }
 0x122   : > { %1399 = vmatpush.msrb.mxu1 %v1291_v60  ;;  %v1581_v60 = vld [vmem:[%s2665_s9 + $0xc0] sm:$0xff] }
 0x123   : > { %1468 = vmatpush.msrb.mxu2 %v1292_v61  ;;  %1416 = vmatpush.msra.mxu3 %v1335_v62  ;;  %v1580_v61 = vld [vmem:[%s2665_s9 + $0xb8] sm:$0xff]  ;;  %v1570_v62 = vld [vmem:[%s2665_s9 + $0x68] sm:$0xff] }
 0x124   : > { %1498 = vmatmul.f32.gmra.mxu0 %v1376_v3  ;;  %1400 = vmatpush.msrb.mxu1 %v1289_v63 }
 0x125   : > { %1469 = vmatpush.msrb.mxu2 %v1290_v1  ;;  %1417 = vmatpush.msra.mxu3 %v1333_v2  ;;  %v1579_v1 = vld [vmem:[%s2665_s9 + $0xb0] sm:$0xff] }
 0x126   : > { %1898 = vmatmul.msk.f32.vlgmr.msrb.gmra.mxu3 %vm762_vm1, %v2386_v37  ;;  %1401 = vmatpush.msrb.mxu1 %v1287_v4  ;;  %v1578_v4 = vld [vmem:[%s2665_s9 + $0xa8] sm:$0xff] }
 0x127   : > { %1470 = vmatpush.msrb.mxu2 %v1288_v5  ;;  %1418 = vmatpush.msra.mxu3 %v1331_v6  ;;  %v1568_v5 = vld [vmem:[%s2665_s9 + $0x58] sm:$0xff]  ;;  %v1577_v6 = vld [vmem:[%s2665_s9 + $0xa0] sm:$0xff] }
 0x128   : > { %1402 = vmatpush.msrb.mxu1 %v1285_v9 }
 0x129   : > { %1471 = vmatpush.msrb.mxu2 %v1286_v12  ;;  %1403 = vmatmul.f32.vlgmr.msrb.gmra.mxu1 %v1366_v54  ;;  %v1576_v12 = vld [vmem:[%s2665_s9 + $0x98] sm:$0xff] }
 0x12a   : > { %1419 = vmatpush.msra.mxu3 %v1329_v13  ;;  %1472 = vmatmul.f32.vlgmr.msrb.gmra.mxu2 %v1366_v54  ;;  %v1566_v13 = vld [vmem:[%s2665_s9 + $0x48] sm:$0xff] }
 0x12b   : > { %1514 = vmatpush.msra.mxu1 %v1356_v14  ;;  %v1575_v14 = vld [vmem:[%s2665_s9 + $0x90] sm:$0xff] }
 0x12c   : > { %1420 = vmatpush.msra.mxu3 %v1327_v15 }
 0x12d   : > { %1515 = vmatpush.msra.mxu1 %v1354_v22  ;;  %v1565_v22 = vld [vmem:[%s2665_s9 + $0x40] sm:$0xff] }
 0x12e   : > { %1421 = vmatpush.msra.mxu3 %v1325_v17  ;;  %v1564_v17 = vld [vmem:[%s2665_s9 + $0x38] sm:$0xff] }
 0x12f   : > { %1899 = vmatmul.msk.f32.gmra.mxu3 %vm762_vm1, %v2360_v27  ;;  %1516 = vmatpush.msra.mxu1 %v1352_v19 }
 0x130   : > { %1422 = vmatpush.msra.mxu3 %v1323_v20  ;;  %v1574_v20 = vld [vmem:[%s2665_s9 + $0x88] sm:$0xff] }
 0x131   : > { %1406 = vmatmul.f32.gmra.mxu1 %v1374_v23 }
 0x132   : > { %1423 = vmatpush.msra.mxu3 %v1321_v21  ;;  %1475 = vmatmul.f32.gmra.mxu2 %v1374_v23  ;;  %v1563_v21 = vld [vmem:[%s2665_s9 + $0x30] sm:$0xff]  ;;  %v1573_v23 = vld [vmem:[%s2665_s9 + $0x80] sm:$0xff] }
 0x133   : > { %1517 = vmatpush.msra.mxu1 %v1350_v24 }
 0x134   : > { %1424 = vmatpush.msra.mxu3 %v1319_v25 }
 0x135   : > { %1609 = vmatpush.msrb.mxu1 %v1588_v45 }
 0x136   : > { %1425 = vmatpush.msra.mxu3 %v1317_v26  ;;  %v1562_v26 = vld [vmem:[%s2665_s9 + $0x28] sm:$0xff] }
 0x137   : > { %1426 = vmatmul.f32.vlgmr.msra.gmra.mxu3 %v2392_v51  ;;  %1610 = vmatpush.msrb.mxu1 %v1587_v47 }
 0x138   : > { %1589 = vmatpush.msrb.mxu3 %v1572_v58 }
 0x139   : > { %1902 = vmatmul.msk.f32.vlgmr.msra.gmra.mxu1 %vm762_vm1, %v2374_v10 }
 0x13a   : > { %1611 = vmatpush.msrb.mxu1 %v1586_v49  ;;  %1590 = vmatpush.msrb.mxu3 %v1571_v59 }
 0x13c   : > { %1612 = vmatpush.msrb.mxu1 %v1585_v50  ;;  %1591 = vmatpush.msrb.mxu3 %v1570_v62 }
 0x13e   : > { %1613 = vmatpush.msrb.mxu1 %v1584_v53 }
 0x13f   : > { %1429 = vmatmul.f32.gmra.mxu3 %v1376_v3  ;;  %v1569_v3 = vld [vmem:[%s2665_s9 + $0x60] sm:$0xff] }
 0x140   : > { %1614 = vmatpush.msrb.mxu1 %v1583_v55  ;;  %1592 = vmatpush.msrb.mxu3 %v1569_v3 }
 0x141   : > { %1903 = vmatmul.msk.f32.gmra.mxu1 %vm762_vm1, %v2382_v29 }
 0x142   : > { %1615 = vmatpush.msrb.mxu1 %v1582_v57  ;;  %1593 = vmatpush.msrb.mxu3 %v1568_v5  ;;  %v1558_v57 = vld [vmem:[%s2665_s9 + $0x8] sm:$0xff] }
 0x144   : > { %1616 = vmatpush.msrb.mxu1 %v1581_v60  ;;  %1594 = vmatpush.msrb.mxu3 %v1567_v8 }
 0x146   : > { %1617 = vmatpush.msrb.mxu1 %v1580_v61  ;;  %1595 = vmatpush.msrb.mxu3 %v1566_v13 }
 0x148   : > { %1618 = vmatpush.msrb.mxu1 %v1579_v1  ;;  %1596 = vmatpush.msrb.mxu3 %v1565_v22 }
 0x14a   : > { %1619 = vmatpush.msrb.mxu1 %v1578_v4  ;;  %1597 = vmatpush.msrb.mxu3 %v1564_v17 }
 0x14c   : > { %1620 = vmatpush.msrb.mxu1 %v1577_v6  ;;  %1598 = vmatpush.msrb.mxu3 %v1563_v21 }
 0x14e   : > { %1621 = vmatpush.msrb.mxu1 %v1576_v12  ;;  %1599 = vmatpush.msrb.mxu3 %v1562_v26  ;;  %v1658_v26 = vld [vmem:[%s2663_s7] sm:$0x3] }
 0x14f   : > { %1905 = vmatpush.msk.msrb.mxu0 %vm1664_vm8, %v1658_v26 }
 0x150   : > { %1622 = vmatpush.msrb.mxu1 %v1575_v14 }
 0x152   : > { %1623 = vmatpush.msrb.mxu1 %v1574_v20 }
 0x154   : > { %1624 = vmatpush.msrb.mxu1 %v1573_v23 }
 0x15f   : > { %v1014_v27 = vpop.f32.mrf.mxu1 }
 0x160   : > { %v1106_v28 = vpop.f32.mrf.mxu0 }
 0x166   : > { %v1037_v30 = vpop.f32.mrf.mxu2 }
 0x167   : > { %v1038_v31 = vadd.f32 %v1037_v30, %v1014_v27  ;;  %v1561_v30 = vld [vmem:[%s2665_s9 + $0x20] sm:$0xff] }
 0x168   : > { %v2410_v11 = vpop.f32.mrf.mxu1  ;;  %1600 = vmatpush.msrb.mxu3 %v1561_v30 }
 0x169   : > { %v2414_v34 = vpop.f32.mrf.mxu0 }
 0x16f   : > { %v2416_v35 = vpop.f32.mrf.mxu2 }
 0x171   : > { %v2422_v37 = vpop.f32.mrf.mxu0 }
 0x173   : > { %v2418_v36 = vpop.f32.mrf.mxu1 }
 0x177   : > { %v2424_v38 = vpop.f32.mrf.mxu2 }
 0x179   : > { %v1060_v32 = vpop.f32.mrf.mxu3  ;;  %v2428_v41 = vpop.f32.mrf.mxu0 }
 0x17a   : > { %v2412_v33 = vadd.f32 %v1060_v32, %v1038_v31 }
 0x17b   : > { %v2426_v39 = vpop.f32.mrf.mxu1 }
 0x17c   : > { %v1158_v49 = vadd.f32 %v2424_v38, %v2412_v33 }
 0x180   : > { %v2430_v43 = vpop.f32.mrf.mxu2 }
 0x181   : > { %v2420_v10 = vpop.f32.mrf.mxu3 }
 0x185   : > { %v2432_v44 = vpop.f32.mrf.mxu1 }
 0x186   : > { %v2448_v51 = vpop.f32.mrf.mxu0  ;;  %v1181_v59 = vadd.f32 %v2432_v44, %v1158_v49 }
 0x189   : > { %v1083_v29 = vpop.f32.mrf.mxu3 }
 0x18a   : > { %v1107_v7 = vadd.f32 %v1106_v28, %v1083_v29 }
 0x18b   : > { %v2450_v52 = vpop.f32.mrf.mxu2 }
 0x18c   : > { %v1130_v15 = vadd.f32 %v2418_v36, %v1107_v7  ;;  %v1560_v36 = vld [vmem:[%s2665_s9 + $0x18] sm:$0xff] }
 0x18d   : > { %v2452_v46 = vpop.f32.mrf.mxu1  ;;  %1601 = vmatpush.msrb.mxu3 %v1560_v36 }
 0x18e   : > { %v1227_v24 = vadd.f32 %v2422_v37, %v1130_v15  ;;  %v1041_v37 = vadd.f32 %v2416_v35, %v2410_v11 }
 0x18f   : > { %v2480_v63 = vpop.f32.mrf.mxu0 }
 0x190   : > { %v1250_v31 = vadd.f32 %v2450_v52, %v1227_v24  ;;  %v1064_v50 = vadd.f32 %v2420_v10, %v1041_v37  ;;  %v1557_v10 = vld [vmem:[%s2665_s9] sm:$0xff]  ;;  %v1631_v24 = vld [vmem:[%s2661_s5 + $0x8] sm:$0xff] }
 0x191   : > { %v1086_v40 = vpop.f32.mrf.mxu3  ;;  %1651 = vmatpush.msra.mxu2 %v1631_v24 }
 0x192   : > { %v1110_v16 = vadd.f32 %v2414_v34, %v1086_v40  ;;  %v1161_v38 = vadd.f32 %v2430_v43, %v1064_v50 }
 0x194   : > { %v1252_v0 = vpop.f32.mrf.mxu2  ;;  %v1133_v25 = vadd.f32 %v2426_v39, %v1110_v16  ;;  %v1529_v39 = vld [vmem:[%s2660_s4] sm:$0x3]  ;;  %v1184_v1 = vadd.f32 %v2452_v46, %v1161_v38 }
 0x195   : > { %v1532_v55 = vperm.slane %v1529_v39, 1  ;;  %v1531_v3 = vperm.slane %v1529_v39, 0  ;;  %v1710_v39 = vld [vmem:[%s2666_s10 + $0x18] sm:$0xff] }
 0x196   : > { %v1230_v32 = vadd.f32 %v2428_v41, %v1133_v25  ;;  %v1559_v41 = vld [vmem:[%s2665_s9 + $0x10] sm:$0xff]  ;;  %v1630_v25 = vld [vmem:[%s2661_s5] sm:$0xff] }
 0x197   : > { %1602 = vmatpush.msrb.mxu3 %v1559_v41  ;;  %1652 = vmatpush.msra.mxu2 %v1630_v25 }
 0x198   : > { %v1496_v18 = vpop.f32.mrf.mxu0  ;;  %v1253_v11 = vadd.f32 %v1252_v0, %v1230_v32  ;;  %v1632_v32 = vld [vmem:[%s2662_s6] sm:$0x1] }
 0x199   : > { %v2440_v48 = vpop.f32.mrf.mxu3  ;;  %1603 = vmatpush.msrb.mxu3 %v1558_v57 }
 0x19a   : > { %v1204_v61 = vadd.f32 %v2440_v48, %v1181_v59 }
 0x19b   : > { %1604 = vmatpush.msrb.mxu3 %v1557_v10 }
 0x19d   : > { %1748 = vmatpush.msra.mxu3 %v1710_v39 }
 0x1a1   : > { %v2460_v56 = vpop.f32.mrf.mxu3  ;;  %v1499_v52 = vpop.f32.mrf.mxu0 }
 0x1a2   : > { %v1207_v5 = vadd.f32 %v2460_v56, %v1184_v1 }
 0x1a6   : > { %v1404_v42 = vpop.f32.mrf.mxu1 }
 0x1a9   : > { %v1272_v2 = vpop.f32.mrf.mxu3 }
 0x1aa   : > { %v1273_v45 = vadd.f32 %v1272_v2, %v1250_v31 }
 0x1ad   : > { %v1473_v54 = vpop.f32.mrf.mxu2 }
 0x1ae   : > { %v2500_v9 = vpop.f32.mrf.mxu1  ;;  %v1497_v28 = vadd.f32 %v1496_v18, %v1473_v54 }
 0x1b2   : > { %v1275_v19 = vpop.f32.mrf.mxu3 }
 0x1b3   : > { %v1276_v60 = vadd.f32 %v1275_v19, %v1253_v11 }
 0x1b5   : > { %v1476_v29 = vpop.f32.mrf.mxu2 }
 0x1b6   : > { %v1519_v27 = vpop.f32.mrf.mxu1  ;;  %v1500_v35 = vadd.f32 %v1499_v52, %v1476_v29  ;;  %v1709_v29 = vld [vmem:[%s2666_s10 + $0x10] sm:$0xff] }
 0x1b7   : > { %v1520_v34 = vadd.f32 %v1519_v27, %v1497_v28  ;;  %1728 = vmatpush.msrb.mxu2 %v1709_v29 }
 0x1b9   : > { %v1526_v53 = vadd.f32 %v1520_v34, %v1273_v45  ;;  %v1708_v45 = vld [vmem:[%s2666_s10 + $0x8] sm:$0xff] }
 0x1ba   : > { %v1427_v40 = vpop.f32.mrf.mxu3  ;;  %1749 = vmatpush.msra.mxu3 %v1708_v45 }
 0x1bb   : > { %v1428_v47 = vadd.f32 %v1427_v40, %v1404_v42  ;;  %v2562_v62 = vadd.f32 %v1532_v55, %v1526_v53  ;;  %v1707_v40 = vld [vmem:[%s2666_s10] sm:$0xff] }
 0x1bc   : > { %1729 = vmatpush.msrb.mxu2 %v1707_v40 }
 0x1bd   : > { %v1451_v42 = vadd.f32 %v2448_v51, %v1428_v47  ;;  %v1540_v43 = vmax.f32 %v2562_v62, 0.0  ;;  %v1659_v47 = vld [vmem:[%s2664_s8] sm:$0x1] }
 0x1be   : > { %v1522_v58 = vpop.f32.mrf.mxu1 }
 0x1bf   : > { %v1523_v33 = vadd.f32 %v1522_v58, %v1500_v35  ;;  %v1525_v44 = vadd.f32 %v1451_v42, %v1204_v61 }
 0x1c1   : > { %v1528_v0 = vadd.f32 %v1523_v33, %v1276_v60  ;;  %v2572_v7 = vadd.f32 %v1531_v3, %v1525_v44 }
 0x1c2   : > { %v1430_v2 = vpop.f32.mrf.mxu3 }
 0x1c3   : > { %v2565_v51 = vadd.f32 %v1532_v55, %v1528_v0  ;;  %v1431_v4 = vadd.f32 %v1430_v2, %v2500_v9  ;;  %v1539_v9 = vmax.f32 %v2572_v7, 0.0 }
 0x1c5   : > { %v1542_v6 = vmax.f32 %v2565_v51, 0.0  ;;  %v1454_v48 = vadd.f32 %v2480_v63, %v1431_v4 }
 0x1c7   : > { %v1550_v46 = vadd.f32 %v1542_v6, %v1540_v43  ;;  %v1527_v8 = vadd.f32 %v1454_v48, %v1207_v5 }
 0x1c9   : > { %v1551_v12 = vrot.slane %v1550_v46, 4  ;;  %v2578_v13 = vadd.f32 %v1531_v3, %v1527_v8 }
 0x1cb   : > { %v1552_v56 = vadd.f32 %v1551_v12, %v1550_v46  ;;  %v1541_v54 = vmax.f32 %v2578_v13, 0.0 }
 0x1cd   : > { %v1553_v14 = vrot.slane %v1552_v56, 2  ;;  %v1543_v63 = vadd.f32 %v1541_v54, %v1539_v9 }
 0x1cf   : > { %v1544_v15 = vrot.slane %v1543_v63, 4  ;;  %v1554_v16 = vadd.f32 %v1553_v14, %v1552_v56 }
 0x1d1   : > { %v1545_v22 = vadd.f32 %v1544_v15, %v1543_v63  ;;  %v1555_v17 = vrot.slane %v1554_v16, 1 }
 0x1d3   : > { %v1556_v18 = vadd.f32 %v1555_v17, %v1554_v16  ;;  %v1546_v19 = vrot.slane %v1545_v22, 2 }
 0x1d5   : > { %1625 = vmatmul.f32.vlgmr.msrb.gmra.mxu1 %v1556_v18  ;;  %v1547_v20 = vadd.f32 %v1546_v19, %v1545_v22 }
 0x1d7   : > { %v1548_v21 = vrot.slane %v1547_v20, 1 }
 0x1d9   : > { %v1549_v23 = vadd.f32 %v1548_v21, %v1547_v20 }
 0x1db   : > { %1605 = vmatmul.f32.vlgmr.msrb.gmra.mxu3 %v1549_v23 }
 0x252   : > { %v1626_v27 = vpop.f32.mrf.mxu1 }
 0x25e   : > { %v1606_v28 = vpop.f32.mrf.mxu3 }
 0x25f   : > { %v1627_v30 = vadd.f32 %v1626_v27, %v1606_v28 }
 0x261   : > { %v1629_v31 = vmul.f32 0.00390625, %v1627_v30 }
 0x263   : > { %1904 = vmatmul.msk.f32.vlgmr.msra.gmra.mxu2 %vm1633_vm9, %v1629_v31 }
 0x2e6   : > { %v1654_v34 = vpop.f32.mrf.mxu2 }
 0x2e7   : > { %v1655_v36 = vadd.f32 %v1654_v34, %v1632_v32 }
 0x2e9   : > { %v1657_v37 = vmax.f32 %v1655_v36, 0.0 }
 0x2eb   : > { %1906 = vmatmul.msk.f32.vlgmr.msrb.gmra.mxu0 %vm1660_vm10, %v1657_v37 }
 0x368   : > { %v1685_v41 = vpop.f32.mrf.mxu0 }
 0x369   : > { %v1686_v49 = vadd.f32 %v1685_v41, %v1659_v47 }
 0x36b   : > { %v1907_v50 = vmul.f32 -1.442695, %v1686_v49 }
 0x36d   : > { %1984 = vpow2.f32 %v1907_v50 }
 0x373   : > { %v1985_v52 = vpop.eup %1984 }
 0x374   : > { %v1691_v11 = vadd.f32 1.0, %v1985_v52 }
 0x376   : > { %1986 = vrcp.f32 %v1691_v11  ;;  %v1703_v57 = vand.u32 2147483648, %v1691_v11  ;;  %v1701_v59 = vand.u32 2147483647, %v1691_v11  ;;  %vm1697_vm12 = vweird.f32 %v1691_v11 }
 0x378   : > { %v1704_v42 = vor.u32 1.1754944e-38, %v1703_v57  ;;  %vm1702_vm14 = vcmp.eq.f32.partialorder %v1701_v59, 8.507059e+37 }
 0x37c   : > { %v1987_v35 = vpop.eup %1986 }
 0x37d   : > { %v1693_v53 = vmul.f32 %v1987_v35, %v1691_v11  ;;  %vm1698_vm11 = vweird.f32 %v1987_v35 }
 0x37e   : > { %vm1699_vm13 = vmor %vm1697_vm12, %vm1698_vm11 }
 0x37f   : > { %v1694_v55 = vsub.f32 1.0, %v1693_v53 }
 0x381   : > { %v1695_v58 = vmul.f32 %v1987_v35, %v1694_v55 }
 0x383   : > { %v1696_v60 = vadd.f32 %v1987_v35, %v1695_v58 }
 0x385   : > { %v1700_v33 = vsel %vm1699_vm13, %v1987_v35, %v1696_v60 }
 0x386   : > { %v1705_v10 = vsel %vm1702_vm14, %v1704_v42, %v1700_v33 }
 0x387   : > { %1908 = vmatmul.msk.f32.vlgmr.msrb.gmra.mxu2 %vm1633_vm9, %v1705_v10  ;;  %1909 = vmatmul.msk.f32.vlgmr.msra.gmra.mxu3 %vm1633_vm9, %v1705_v10 }
 0x40a   : > { %v1731_v38 = vpop.f32.mrf.mxu2  ;;  %v1751_v61 = vpop.f32.mrf.mxu3 }
 0x40b   : > { %v1754_v0 = vperm.slane %v1731_v38, 0  ;;  %v1755_v1 = vperm.slane %v1751_v61, 0 }
 0x40d   : > { %v1756_v2 = vmul.f32 %v1754_v0, %v1539_v9  ;;  %v1758_v44 = vmul.f32 %v1754_v0, %v1541_v54  ;;  %v1757_v3 = vmul.f32 %v1755_v1, %v1540_v43  ;;  %v1759_v4 = vmul.f32 %v1755_v1, %v1542_v6 }
 0x40f   : > { %1760 = vst [vmem:[%s413_s15] sm:$0xff] %v1756_v2 }
 0x410   : > { %1762 = vst [vmem:[%s413_s15 + $0x10] sm:$0xff] %v1758_v44 }
 0x411   : > { %1761 = vst [vmem:[%s413_s15 + $0x8] sm:$0xff] %v1757_v3 }
 0x412   : > { %1763 = vst [vmem:[%s413_s15 + $0x18] sm:$0xff] %v1759_v4 }
 0x413   : > { %2075 = shalt.err (!%p2072_p8)
}
 0x414   : > { %s2127_s1 = smov 256   ;;  %s2128_s13 = smov 16  }
 0x415   : > { %1925 = dma.vmem_to_hbm [thread:$0]  (%p2227_p5), %s1778_s16, 512, %s1780_s21, %s1765_s22, %s2127_s1, %s2127_s1, %s2128_s13  }
 0x416 PF: > { %p1942_p9 = scmp.ge.s32.totalorder %s2118_s20, 2  ;;  %s1794_s14 = sand.u32 1, %s2106_s17  }
 0x417   : > { %s1795_s15 = scalar_lea.sflag [#allocation5], %s1794_s14 }
 0x418   : > { %p1935_p10 = pnand %p1942_p9, %p2231_p6 }
 0x41a   : > { %p1936_p11 = pneg %p1935_p10 }
 0x41c   : > { %2101 = dma.done.wait (%p1936_p11), %s1795_s15, 512  }
 0x41d   : > { %2103 = vsyncadd (%p1936_p11), %s1795_s15, 4294966784  ;;  %s2676_s24 = sld [smem:[#allocation12_spill]]  ;;  %p23_p12 = scmp.ge.s32.totalorder %s2214_s23, 4  }
 0x41e   : > { %s2677_s19 = sld [smem:[#allocation13_spill]]  ;;  %s2678_s17 = smov %s2110_s18 }
 0x41f   : > { %s2680_s20 = smov %s2214_s23  ;;  %25 = sbr.rel (!%p23_p12) target bundleno = 7 (0x7), region = 112 }
 0x423   : > { %s2679_s18 = smov %s2676_s24 }
 0x424   :  { %1801 = vsyncpa [#allocation4], 1 }
 0x425   :  { %1803 = vsyncpa [#allocation4 + $0x1], 1 }
 0x426   :  { %1804 = vsyncpa [#allocation7], 1 }
 0x427   :  { %1805 = vsyncpa [#allocation5], 1 }
 0x428   :  { %1807 = vsyncpa [#allocation5 + $0x1], 1 }

</bundles_post_ra>
